<compile_context>
chip_gen: v6e
topology: v6e:2x2x1
jax: 0.10.0
libtpu: 0.0.40
codegen_flags: <defaults>
</compile_context>

<pallas_src>
import jax
import jax.numpy as jnp
from jax.experimental import pallas as pl
from jax.experimental.pallas import tpu as pltpu


# ---------------------------------------------------------------------------
# Generation-dependent VMEM budgets.
# ---------------------------------------------------------------------------
def _vmem_budget():
    """Returns (per-buffer hs budget bytes, vmem_limit_bytes)."""
    kind = ""
    try:
        kind = jax.devices()[0].device_kind.lower()
    except Exception:
        pass
    if "v7" in kind or "7x" in kind:
        # 64 MiB physical VMEM, ~3.2 TB/s HBM: keep the double-buffered hs
        # stream <= ~24 MiB and cap scoped VMEM well below physical.
        return 12 * 1024 * 1024, 48 * 1024 * 1024
    if "v5" in kind or "v6" in kind:
        # 128 MiB physical VMEM: large streaming tiles amortize the per-step
        # overhead; raise the scoped limit above the 16/32 MiB defaults.
        return 32 * 1024 * 1024, 96 * 1024 * 1024
    # Unknown backend (e.g. interpret mode): conservative.
    return 8 * 1024 * 1024, 48 * 1024 * 1024


def _batch_tile(B: int) -> int:
    # Sublane-friendly 8-row tiles; >= 2 batch tiles whenever possible so the
    # "parallel" batch axis can be sharded across both v7x TensorCores.
    if B % 8 == 0 and B >= 16:
        return 8
    return B


def _seq_tile(S: int, tb: int, H: int, itemsize: int, budget: int) -> int:
    """Largest multiple-of-128 sequence tile dividing (padded) S whose
    double-buffered hs stream fits the per-generation budget."""
    if S <= 128:
        return S
    cap = max(128, budget // (2 * tb * H * itemsize))
    ts = min((cap // 128) * 128, S)
    while ts >= 128:
        if S % ts == 0:
            return ts
        ts -= 128
    return 128


def _pad_seq(hs, mask):
    """Zero-pad the sequence axis to a multiple of 128 (mask padding is zero,
    so the pooled result is unchanged)."""
    S = hs.shape[1]
    if S <= 128 or S % 128 == 0:
        return hs, mask
    pad = ((S + 127) // 128) * 128 - S
    hs = jnp.pad(hs, ((0, 0), (0, pad), (0, 0)))
    mask = jnp.pad(mask, ((0, 0), (0, pad)))
    return hs, mask


# ---------------------------------------------------------------------------
# Kernel: masked mean-pool accumulated over the sequence grid axis, with the
# (pre-folded) fc1 -> fc2 head applied once in the finalize branch.
# ---------------------------------------------------------------------------
def amp_head_kernel(hs_ref, mask_ref, w_ref, b_ref, out_ref, emb_acc, mask_acc):
    # hs_ref:   (tb, ts, H)   activation tile (f32 or bf16)
    # mask_ref: (tb, ts)      attention-mask tile in the activation dtype
    # w_ref:    (1, H)        folded weight (w1 @ w2)^T, lane-dense, f32
    # b_ref:    (1,)          folded bias  b1 @ w2 + b2  (SMEM scalar)
    # out_ref:  (tb, 1)       output block, resident across the seq axis
    # emb_acc:  (tb, 1, H) f32  masked-sum accumulator (VMEM scratch)
    # mask_acc: (tb, 1)    f32  mask-count accumulator (VMEM scratch)
    s = pl.program_id(1)

    @pl.when(s == 0)
    def _init():
        emb_acc[...] = jnp.zeros_like(emb_acc)
        mask_acc[...] = jnp.zeros_like(mask_acc)

    hs = hs_ref[...]                      # (tb, ts, H)
    mask = mask_ref[...]                  # (tb, ts)

    # Masked partial sum on the MXU: batched (1, ts) x (ts, H) contraction per
    # batch row, accumulated in f32 (accuracy preserved for bf16 streams, no
    # (tb, ts, H) f32 VPU intermediate).
    emb_acc[...] += jnp.einsum(
        "bqs,bsh->bqh", mask[:, None, :], hs,
        preferred_element_type=jnp.float32)                       # (tb, 1, H)
    mask_acc[...] += jnp.sum(mask.astype(jnp.float32), axis=1,
                             keepdims=True)                       # (tb, 1)

    # Clamp + divide + folded linear head only after the full sequence.
    @pl.when(s == pl.num_programs(1) - 1)
    def _finalize():
        sum_mask = jnp.maximum(mask_acc[...], 1e-9)               # (tb, 1)
        # Lane-dense (1, H) weight: VPU mul + XLU lane reduce (no N=1 matmul).
        pooled = jnp.sum(emb_acc[...] * w_ref[...], axis=2)       # (tb, 1)
        # (sum_emb @ w) / sum_mask == (sum_emb / sum_mask) @ w  (row scalar)
        out_ref[...] = pooled / sum_mask + b_ref[0]


def amp_forward(last_hidden_state, attention_mask, w1, b1, w2, b2,
                *, tb=None, ts=None):
    """MeanPooling -> fc1 -> fc2 with fc2 folded into fc1 on the host:
    w = (w1 @ w2)^T, b = b1 @ w2 + b2, out = mean_pool(hs, mask) @ w^T + b."""
    act_dtype = last_hidden_state.dtype
    # Stream the mask at the activation width (0/1 is exact in bf16).
    mask = attention_mask.astype(act_dtype)
    last_hidden_state, mask = _pad_seq(last_hidden_state, mask)
    B, S, H = last_hidden_state.shape

    budget, vmem_limit = _vmem_budget()
    if tb is None:
        tb = _batch_tile(B)
    if ts is None:
        ts = _seq_tile(S, tb, H, jnp.dtype(act_dtype).itemsize, budget)
    assert B % tb == 0 and S % ts == 0, (B, tb, S, ts)
    n_seq = S // ts

    # Fold fc2 into fc1 (exact): (H,1) column -> lane-dense (1,H) row.
    w_fold = jnp.dot(w1, w2).reshape(1, H).astype(jnp.float32)
    b_fold = (jnp.dot(b1.reshape(1, -1), w2.reshape(-1, 1)).reshape(())
              + jnp.asarray(b2).reshape(())).reshape((1,)).astype(jnp.float32)

    # 3-deep buffering helps only when the per-step DMA is tiny and there are
    # enough steps for the extra buffer to matter.
    buffering = pl.Buffered(3) if (ts <= 256 and n_seq >= 4) else None
    stream_kwargs = {"pipeline_mode": buffering} if buffering is not None else {}

    return pl.pallas_call(
        amp_head_kernel,
        out_shape=jax.ShapeDtypeStruct((B, 1), jnp.float32),
        grid=(B // tb, n_seq),
        in_specs=[
            # Activation stream: tiled over (batch, seq).
            pl.BlockSpec((tb, ts, H), lambda b, s: (b, s, 0), **stream_kwargs),
            # Mask stream: tiled the same way, activation dtype.
            pl.BlockSpec((tb, ts), lambda b, s: (b, s), **stream_kwargs),
            # Folded weight: constant block index -> DMA'd into VMEM once.
            pl.BlockSpec((1, H), lambda b, s: (0, 0)),
            # Folded bias: scalar in SMEM.
            pl.BlockSpec(memory_space=pltpu.MemorySpace.SMEM),
        ],
        # Output block is resident across the sequence (reduction) axis and
        # written exactly once, in the finalize branch.
        out_specs=pl.BlockSpec((tb, 1), lambda b, s: (b, 0)),
        scratch_shapes=[
            pltpu.VMEM((tb, 1, H), jnp.float32),   # masked-sum accumulator
            pltpu.VMEM((tb, 1), jnp.float32),      # mask-count accumulator
        ],
        compiler_params=pltpu.CompilerParams(
            # batch axis: parallel (megacore sharding on v7x);
            # sequence axis: reduction -> arbitrary.
            dimension_semantics=("parallel", "arbitrary"),
            vmem_limit_bytes=vmem_limit),
    )(last_hidden_state, mask, w_fold, b_fold)


def reference_forward(last_hidden_state, attention_mask, w1, b1, w2, b2):
    m = attention_mask.astype(jnp.float32)[:, :, None]
    x = last_hidden_state.astype(jnp.float32)
    sum_emb = jnp.sum(x * m, axis=1)
    sum_mask = jnp.maximum(jnp.sum(m, axis=1), 1e-9)
    feat = sum_emb / sum_mask
    return (feat @ w1 + b1) @ w2 + b2


if __name__ == "__main__":
    B, S, H, P = 16, 256, 128, 16      # batch, seq, hidden_size, cfg.pca_dim
    initializer_range = 0.02           # self.config.initializer_range

    key = jax.random.PRNGKey(0)
    k_hs, k_w1, k_w2 = jax.random.split(key, 3)

    # Synthetic "backbone output" (last_hidden_state) and variable-length mask.
    last_hidden_state = jax.random.normal(k_hs, (B, S, H), dtype=jnp.float32)
    lengths = jnp.array([S - (17 * i) % (S // 2) for i in range(B)],
                        dtype=jnp.int32)
    attention_mask = (jnp.arange(S)[None, :] < lengths[:, None]).astype(
        jnp.int32)  # (B, S)

    # _init_weights: normal(mean=0, std=initializer_range), bias zero.
    w1 = initializer_range * jax.random.normal(k_w1, (H, P), dtype=jnp.float32)
    b1 = jnp.zeros((P,), dtype=jnp.float32)
    w2 = initializer_range * jax.random.normal(k_w2, (P, 1), dtype=jnp.float32)
    b2 = jnp.zeros((1,), dtype=jnp.float32)

    ref = reference_forward(last_hidden_state, attention_mask, w1, b1, w2, b2)

    # 1) f32 activations, auto tile selection.
    out_f32 = jax.block_until_ready(
        amp_forward(last_hidden_state, attention_mask, w1, b1, w2, b2))
    # 2) f32, explicit ts=128 -> exercises the multi-step sequence reduction.
    out_tiled = jax.block_until_ready(
        amp_forward(last_hidden_state, attention_mask, w1, b1, w2, b2, ts=128))
    # 3) bf16 activations + non-128-multiple S -> exercises host-side padding
    #    and the bf16 MXU accumulation path.
    S2 = 200
    hs_bf16 = last_hidden_state[:, :S2, :].astype(jnp.bfloat16)
    mask2 = attention_mask[:, :S2]
    ref_bf16 = reference_forward(hs_bf16, mask2, w1, b1, w2, b2)
    out_bf16 = jax.block_until_ready(
        amp_forward(hs_bf16, mask2, w1, b1, w2, b2))

    assert out_f32.shape == (B, 1)
    assert out_tiled.shape == (B, 1)
    assert out_bf16.shape == (B, 1)
    assert jnp.allclose(out_f32, ref, atol=2e-5, rtol=2e-2), (out_f32, ref)
    assert jnp.allclose(out_tiled, ref, atol=2e-5, rtol=2e-2), (out_tiled, ref)
    assert jnp.allclose(out_bf16, ref_bf16, atol=1e-4, rtol=2e-2), (out_bf16,
                                                                    ref_bf16)

    print("KERNEL_OK")
</pallas_src>

<mosaic_0001>
module attributes {stable_mosaic.version = 11 : i64} {
  func.func @amp_head_kernel(%arg0: i32, %arg1: i32, %arg2: memref<8x256x128xf32, #tpu.memory_space<vmem>>, %arg3: memref<8x256xf32, #tpu.memory_space<vmem>>, %arg4: memref<1x128xf32, #tpu.memory_space<vmem>>, %arg5: memref<1xf32, #tpu.memory_space<smem>>, %arg6: memref<8x1xf32, #tpu.memory_space<vmem>>, %arg7: memref<8x1x128xf32, #tpu.memory_space<vmem>>, %arg8: memref<8x1xf32, #tpu.memory_space<vmem>>) attributes {dimension_semantics = [#tpu.dimension_semantics<parallel>, #tpu.dimension_semantics<arbitrary>], iteration_bounds = array<i64: 2, 1>, scalar_prefetch = 0 : i64, scratch_operands = 2 : i64, tpu.core_type = #tpu.core_type<tc>, window_params = [{transform_indices = @transform_0, window_bounds = array<i64: 8, 256, 128>}, {transform_indices = @transform_1, window_bounds = array<i64: 8, 256>}, {pipeline_mode = #tpu.pipeline_mode<synchronous>, transform_indices = @transform_2, window_bounds = array<i64: 1, 128>}, {transform_indices = @transform_3, window_bounds = array<i64: 1>}, {transform_indices = @transform_4, window_bounds = array<i64: 8, 1>}]} {
    %c0_i32 = arith.constant 0 : i32
    %0 = arith.cmpi eq, %arg1, %c0_i32 : i32
    %1 = arith.extui %0 : i1 to i32
    %c0_i32_0 = arith.constant 0 : i32
    %2 = arith.cmpi ne, %1, %c0_i32_0 : i32
    scf.if %2 {
      %cst_18 = arith.constant 0.000000e+00 : f32
      %18 = vector.broadcast %cst_18 : f32 to vector<8x1x128xf32>
      %c0_19 = arith.constant 0 : index
      %c0_20 = arith.constant 0 : index
      %c0_21 = arith.constant 0 : index
      %19 = vector.load %arg7[%c0_19, %c0_20, %c0_21] : memref<8x1x128xf32, #tpu.memory_space<vmem>>, vector<8x1x128xf32>
      tpu.vector_store %arg7[%c0_19, %c0_20, %c0_21], %18 {strides = array<i32>} : memref<8x1x128xf32, #tpu.memory_space<vmem>>, vector<8x1x128xf32>,
      %cst_22 = arith.constant 0.000000e+00 : f32
      %20 = vector.broadcast %cst_22 : f32 to vector<8x1xf32>
      %c0_23 = arith.constant 0 : index
      %c0_24 = arith.constant 0 : index
      %21 = vector.load %arg8[%c0_23, %c0_24] : memref<8x1xf32, #tpu.memory_space<vmem>>, vector<8x1xf32>
      tpu.vector_store %arg8[%c0_23, %c0_24], %20 {strides = array<i32>} : memref<8x1xf32, #tpu.memory_space<vmem>>, vector<8x1xf32>,
    } else {
    }
    %c0 = arith.constant 0 : index
    %c0_1 = arith.constant 0 : index
    %c0_2 = arith.constant 0 : index
    %3 = vector.load %arg2[%c0, %c0_1, %c0_2] : memref<8x256x128xf32, #tpu.memory_space<vmem>>, vector<8x256x128xf32>
    %c0_3 = arith.constant 0 : index
    %c0_4 = arith.constant 0 : index
    %4 = vector.load %arg3[%c0_3, %c0_4] : memref<8x256xf32, #tpu.memory_space<vmem>>, vector<8x256xf32>
    %c0_5 = arith.constant 0 : index
    %c0_6 = arith.constant 0 : index
    %c0_7 = arith.constant 0 : index
    %5 = vector.load %arg7[%c0_5, %c0_6, %c0_7] : memref<8x1x128xf32, #tpu.memory_space<vmem>>, vector<8x1x128xf32>
    %6 = vector.shape_cast %4 : vector<8x256xf32> to vector<8x1x256xf32>
    "tpu.trace_start"() <{level = 10 : i32, message = "bqs,bsh->bqh"}> : () -> ()
    %cst = arith.constant dense<0.000000e+00> : vector<8x1x128xf32>
    %7 = tpu.matmul %6, %3, %cst {dimension_numbers = #tpu.dot_dimension_numbers<[2], [1], [1], [2], [0, 0, 0, 1, 1, 2], [0], [0]>} : vector<8x1x256xf32>, vector<8x256x128xf32>, vector<8x1x128xf32> -> vector<8x1x128xf32>
    "tpu.trace_stop"() : () -> ()
    %8 = arith.addf %5, %7 : vector<8x1x128xf32>
    %c0_8 = arith.constant 0 : index
    %c0_9 = arith.constant 0 : index
    %c0_10 = arith.constant 0 : index
    %9 = vector.load %arg7[%c0_8, %c0_9, %c0_10] : memref<8x1x128xf32, #tpu.memory_space<vmem>>, vector<8x1x128xf32>
    tpu.vector_store %arg7[%c0_8, %c0_9, %c0_10], %8 {strides = array<i32>} : memref<8x1x128xf32, #tpu.memory_space<vmem>>, vector<8x1x128xf32>,
    %c0_11 = arith.constant 0 : index
    %c0_12 = arith.constant 0 : index
    %10 = vector.load %arg8[%c0_11, %c0_12] : memref<8x1xf32, #tpu.memory_space<vmem>>, vector<8x1xf32>
    %cst_13 = arith.constant dense<0.000000e+00> : vector<8xf32>
    %11 = vector.multi_reduction <add>, %4, %cst_13 [1] : vector<8x256xf32> to vector<8xf32>
    %12 = vector.shape_cast %11 : vector<8xf32> to vector<8x1xf32>
    %13 = arith.addf %10, %12 : vector<8x1xf32>
    %c0_14 = arith.constant 0 : index
    %c0_15 = arith.constant 0 : index
    %14 = vector.load %arg8[%c0_14, %c0_15] : memref<8x1xf32, #tpu.memory_space<vmem>>, vector<8x1xf32>
    tpu.vector_store %arg8[%c0_14, %c0_15], %13 {strides = array<i32>} : memref<8x1xf32, #tpu.memory_space<vmem>>, vector<8x1xf32>,
    %c0_i32_16 = arith.constant 0 : i32
    %15 = arith.cmpi eq, %arg1, %c0_i32_16 : i32
    %16 = arith.extui %15 : i1 to i32
    %c0_i32_17 = arith.constant 0 : i32
    %17 = arith.cmpi ne, %16, %c0_i32_17 : i32
    scf.if %17 {
      %c0_18 = arith.constant 0 : index
      %c0_19 = arith.constant 0 : index
      %18 = vector.load %arg8[%c0_18, %c0_19] : memref<8x1xf32, #tpu.memory_space<vmem>>, vector<8x1xf32>
      %cst_20 = arith.constant 9.99999971E-10 : f32
      %19 = vector.broadcast %cst_20 : f32 to vector<8x1xf32>
      %20 = arith.maximumf %18, %19 : vector<8x1xf32>
      %c0_21 = arith.constant 0 : index
      %c0_22 = arith.constant 0 : index
      %c0_23 = arith.constant 0 : index
      %21 = vector.load %arg7[%c0_21, %c0_22, %c0_23] : memref<8x1x128xf32, #tpu.memory_space<vmem>>, vector<8x1x128xf32>
      %c0_24 = arith.constant 0 : index
      %c0_25 = arith.constant 0 : index
      %22 = vector.load %arg4[%c0_24, %c0_25] : memref<1x128xf32, #tpu.memory_space<vmem>>, vector<1x128xf32>
      %23 = vector.shape_cast %22 : vector<1x128xf32> to vector<1x1x128xf32>
      %24 = vector.broadcast %23 : vector<1x1x128xf32> to vector<8x1x128xf32>
      %25 = arith.mulf %21, %24 : vector<8x1x128xf32>
      %cst_26 = arith.constant dense<0.000000e+00> : vector<8x1xf32>
      %26 = vector.multi_reduction <add>, %25, %cst_26 [2] : vector<8x1x128xf32> to vector<8x1xf32>
      %27 = arith.divf %26, %20 : vector<8x1xf32>
      %c0_27 = arith.constant 0 : index
      %28 = memref.load %arg5[%c0_27] : memref<1xf32, #tpu.memory_space<smem>>
      %29 = vector.broadcast %28 : f32 to vector<8x1xf32>
      %30 = arith.addf %27, %29 : vector<8x1xf32>
      %c0_28 = arith.constant 0 : index
      %c0_29 = arith.constant 0 : index
      %31 = vector.load %arg6[%c0_28, %c0_29] : memref<8x1xf32, #tpu.memory_space<vmem>>, vector<8x1xf32>
      tpu.vector_store %arg6[%c0_28, %c0_29], %30 {strides = array<i32>} : memref<8x1xf32, #tpu.memory_space<vmem>>, vector<8x1xf32>,
    } else {
    }
    return
  }
  func.func @transform_0(%arg0: i32, %arg1: i32) -> (i32, i32, i32) {
    %c0_i32 = arith.constant 0 : i32
    %c0_i32_0 = arith.constant 0 : i32
    return %arg0, %arg1, %c0_i32 : i32, i32, i32
  }
  func.func @transform_1(%arg0: i32, %arg1: i32) -> (i32, i32) {
    %c0_i32 = arith.constant 0 : i32
    return %arg0, %arg1 : i32, i32
  }
  func.func @transform_2(%arg0: i32, %arg1: i32) -> (i32, i32) {
    %c0_i32 = arith.constant 0 : i32
    %c0_i32_0 = arith.constant 0 : i32
    %c0_i32_1 = arith.constant 0 : i32
    return %c0_i32, %c0_i32_0 : i32, i32
  }
  func.func @transform_3(%arg0: i32, %arg1: i32) -> i32 {
    %c0_i32 = arith.constant 0 : i32
    %c0_i32_0 = arith.constant 0 : i32
    return %c0_i32 : i32
  }
  func.func @transform_4(%arg0: i32, %arg1: i32) -> (i32, i32) {
    %c0_i32 = arith.constant 0 : i32
    %c0_i32_0 = arith.constant 0 : i32
    return %arg0, %c0_i32 : i32, i32
  }
}

</mosaic_0001>

<bundles_post_ra>
// kernel: tpu_custom_call.1
= control target key start
LH: loop header
LB: loop body
LE: loop exit
PB: predicated region body
PF: predicated region fallthrough
CT: control target
= control target key end

     0   :  { %s2635_s0 = inlined_call_operand.hbm [shape: f32[16,256,128], index: 0, kind: input, shape index: {}]   ;;  %s2636_s1 = inlined_call_operand.hbm [shape: f32[16,256], index: 1, kind: input, shape index: {}]   ;;  %s2637_s2 = inlined_call_operand.hbm [shape: f32[1,128], index: 2, kind: input, shape index: {}]   ;;  %s2638_s3 = inlined_call_operand.<no memory space> [shape: f32[1], index: 3, kind: input, shape index: {}]   ;;  %s2639_s4 = inlined_call_operand.vmem [shape: f32[16,1], index: 4, kind: output, shape index: {}]  }
   0x1   :  { %2643 = sst [smem:[#allocation13_spill]] %s2635_s0 }
   0x2   :  { %2644 = sst [smem:[#allocation14_spill]] %s2637_s2 }
   0x3   :  { %9 = sst [smem:[#allocation4]] %s2638_s3 }
   0x4   :  { %10 = vsyncpa [#allocation6], 0 }
   0x5   :  { %12 = vsyncpa [#allocation6 + $0x1], 0 }
   0x6   :  { %13 = vsyncpa [#allocation8], 0 }
   0x7   :  { %15 = vsyncpa [#allocation8 + $0x1], 0  ;;  %s2138_s17 = smov 0   ;;  %s2140_s18 = smov 0  }
   0x8   :  { %s2142_s19 = smov 0   ;;  %s2144_s20 = smov 0  }
   0x9   :  { %s2146_s21 = smov 0   ;;  %s2148_s22 = smov 0  }
   0xa LB: > { %s2642_s3 = sadd.s32 4294967295, %s2101_s22   ;;  %s42_s23 = sadd.s32 1, %s2089_s19  ;;  %s2101_s22 = sphi %s2148_s22, %s21_s22   ;;  %s2097_s21 = sphi %s2146_s21, %s2659_s21   ;;  %s2093_s20 = sphi %s2144_s20, %s2658_s20   ;;  %s2089_s19 = sphi %s2142_s19, %s2657_s19   ;;  %s2085_s18 = sphi %s2140_s18, %s2656_s18   ;;  %s2081_s17 = sphi %s2138_s17, %s2655_s17  }
   0xb   : > { %p49_p0 = scmp.ne.s32.totalorder %s2089_s19, %s2085_s18  ;;  %p50_p1 = scmp.eq.s32.totalorder %s2101_s22, 0 }
   0xc   : > { %p55_p2 = scmp.ne.s32.totalorder %s2085_s18, %s2081_s17  ;;  %p2174_p3 = scmp.eq.s32.totalorder %s2642_s3, 0 }
   0xd   : > { %p51_p4 = por %p50_p1, %p49_p0  ;;  %p1568_p5 = scmp.ge.s32.totalorder %s2101_s22, 1 }
   0xe   : > { %p2181_p6 = por %p2174_p3, %p55_p2  ;;  %p162_p7 = scmp.lt.s32.totalorder %s2101_s22, 3 }
   0xf   : > { %s2103_s27 = smov [#allocation9]   ;;  %p1888_p10 = scmp.lt.s32.totalorder %s2101_s22, 2 }
  0x10   : > { %s2646_s25 = scalar_select %p2181_p6, 1, 0 }
  0x11   : > { %p2186_p8 = pnand %p1568_p5, %p162_p7  ;;  %s175_s28 = sshll.u32 %s2103_s27, 4  ;;  %s176_s28 = int_to_ptr.vmem [resolvable:$true] %s175_s28 }
  0x12   : > { %s2194_s29 = sand.u32 1, %s2089_s19   ;;  %p2198_p12 = pnand %p1888_p10, %p51_p4 }
  0x13   : > { %s2647_s26 = scalar_select %p2186_p8, 1, 0 }
  0x14   : > { %p1876_p9 = pneg %p2186_p8  ;;  %s1972_s5 = scalar_lea.vmem %s176_s28, 16 }
  0x15   : > { %p1973_p0 = scmp.ne.s32.totalorder %s176_s28, %s1972_s5  ;;  %s1979_s6 = scalar_lea.vmem %s176_s28, 32 }
  0x16   : > { %p1877_p11 = pnand %p1876_p9, %p2174_p3  ;;  %p1980_p5 = scmp.lt.s32.totalorder %s176_s28, %s176_s28 }
  0x17   : > { %p1981_p7 = scmp.lt.s32.totalorder %s1979_s6, %s1972_s5 }
  0x18   : > { %p1963_p13 = pneg %p1877_p11 }
  0x19   : > { %p1982_p6 = por %p1981_p7, %p1980_p5 }
  0x1a   : > { %p1975_p1 = pnand %p1973_p0, %p1963_p13 }
  0x1c   : > { %p1976_p2 = pneg %p1975_p1 }
  0x1e   : > { %p1983_p8 = pnand %p1982_p6, %p1976_p2 }
  0x20   : > { %1986 = shalt.err (!%p1983_p8)
}
  0x21   : > { %s2649_s2 = sld [smem:[#allocation14_spill]]  ;;  %s33_s9 = sadd.s32 1, %s2097_s21 }
  0x22   : > { %s1571_s10 = sshll.u32 %s2194_s29, 11  ;;  %p35_p4 = scmp.ge.s32.totalorder %s33_s9, 2 }
  0x23   : > { %s1586_s11 = sshll.u32 %s2097_s21, 15  ;;  %s193_s12 = scalar_lea.vmem [#allocation5], %s1571_s10 }
  0x24   : > { %s203_s13 = sshll.u32 %s193_s12, 4  ;;  %s2661_s9 = smov (%p35_p4, %s33_s9), 0  ;;  %s204_s13 = int_to_ptr.vmem [resolvable:$true] %s203_s13 }
  0x25   : > { %s2650_s0 = sld [smem:[#allocation13_spill]]  ;;  %s37_s17 = ssub.s32 %s2097_s21, %s2661_s9 }
  0x26   : > { %p2215_p6 = scmp.eq.s32.totalorder %s37_s17, 0  ;;  %p1989_p8 = pneg %p2198_p12 }
  0x27   : > { %1879 = dma.hbm_to_vmem [thread:$0]  (!%p1877_p11), %s2649_s2, 16, %s176_s28, [#allocation8]  }
  0x28   : > { %s190_s28 = scalar_lea.sflag [#allocation6], %s2194_s29  ;;  %s2000_s5 = scalar_lea.vmem %s204_s13, 32768 }
  0x29   : > { %p2001_p9 = scmp.ne.s32.totalorder %s204_s13, %s2000_s5  ;;  %s2104_s6 = smov [#allocation5]  }
  0x2a   : > { %s2005_s7 = sshll.u32 %s2104_s6, 4  ;;  %s2006_s7 = int_to_ptr.vmem [resolvable:$false] %s2005_s7 }
  0x2b   : > { %s202_s16 = scalar_lea.hbm %s2650_s0, %s1586_s11  ;;  %p2003_p10 = pnand %p2001_p9, %p1989_p8 }
  0x2c   : > { %s2007_s8 = scalar_lea.vmem %s2006_s7, 65536  ;;  %p2008_p13 = scmp.lt.s32.totalorder %s204_s13, %s2006_s7 }
  0x2d   : > { %p2004_p11 = pneg %p2003_p10  ;;  %p2009_p0 = scmp.lt.s32.totalorder %s2007_s8, %s2000_s5 }
  0x2f   : > { %p2010_p1 = por %p2009_p0, %p2008_p13 }
  0x31   : > { %p2011_p2 = pnand %p2010_p1, %p2004_p11 }
  0x33   : > { %2014 = shalt.err (!%p2011_p2)
}
  0x34   : > { %s2105_s10 = smov 128   ;;  %s2106_s11 = smov 8  }
  0x35   : > { %1883 = dma.hbm_to_vmem [thread:$0]  (!%p2198_p12), %s202_s16, 32768, %s204_s13, %s190_s28, %s2105_s10, %s2105_s10, %s2106_s11  }
  0x36   : > { %s2232_s12 = scalar_select %p2215_p6, %s2089_s19, %s42_s23  }
  0x37   : > { %s213_s14 = sand.u32 1, %s2101_s22   ;;  %s1575_s15 = sshll.u32 %s2194_s29, 4 }
  0x38   : > { %s1587_s17 = sshll.u32 %s2097_s21, 8  ;;  %s217_s5 = scalar_lea.vmem [#allocation7], %s1575_s15 }
  0x39   : > { %s227_s6 = sshll.u32 %s217_s5, 4  ;;  %s225_s3 = scalar_lea.hbm %s2636_s1, %s1587_s17  ;;  %s228_s6 = int_to_ptr.vmem [resolvable:$true] %s227_s6 }
  0x3a   : > { %s214_s0 = scalar_lea.sflag [#allocation8], %s213_s14  ;;  %s2028_s2 = scalar_lea.vmem %s228_s6, 256 }
  0x3b   : > { %p2029_p5 = scmp.ne.s32.totalorder %s228_s6, %s2028_s2  ;;  %s2107_s13 = smov [#allocation7]  }
  0x3c   : > { %s2033_s23 = sshll.u32 %s2107_s13, 4  ;;  %s2034_s23 = int_to_ptr.vmem [resolvable:$false] %s2033_s23 }
  0x3d   : > { %p2031_p7 = pnand %p2029_p5, %p1989_p8  ;;  %s2035_s16 = scalar_lea.vmem %s2034_s23, 512 }
  0x3e   : > { %p2036_p6 = scmp.lt.s32.totalorder %s228_s6, %s2034_s23  ;;  %p2037_p9 = scmp.lt.s32.totalorder %s2035_s16, %s2028_s2 }
  0x3f   : > { %p2032_p4 = pneg %p2031_p7 }
  0x40   : > { %p2038_p10 = por %p2037_p9, %p2036_p6 }
  0x42   : > { %p2039_p11 = pnand %p2038_p10, %p2032_p4 }
  0x44   : > { %2042 = shalt.err (!%p2039_p11)
}
  0x45   : > { %1886 = dma.hbm_to_vmem [thread:$0]  (!%p2198_p12), %s225_s3, 256, %s228_s6, %s214_s0  }
  0x46   : > { %p2652_p13 = scmp.ne.s32.totalorder %s2647_s26, 0 }
  0x47   : > { %s238_s29 = sand.u32 (!%p2652_p13), 1, %s2085_s18   ;;  %p2653_p8 = scmp.ne.s32.totalorder (!%p2652_p13), %s2646_s25, 0 }
  0x48   : > { %236 = sbr.rel (%p2652_p13) target bundleno = 579 (0x243), region = 36  ;;  %s1579_s27 = sshll.u32 (!%p2652_p13), %s238_s29, 11 }
  0x49   : > { %s239_s28 = scalar_lea.sflag (!%p2652_p13), [#allocation6], %s238_s29  ;;  %s2248_s10 = scalar_lea.vmem (!%p2652_p13), [#allocation5], %s1579_s27 }
  0x4d   : > { %2068 = dma.done.wait (%p2653_p8), %s239_s28, 32768  }
  0x4e   : > { %2070 = vsyncadd (%p2653_p8), %s239_s28, 4294934528  ;;  %s2654_s2 = sadd.s32 4294967295, %s2101_s22   ;;  %s1580_s0 = sshll.u32 %s238_s29, 4 }
  0x4f   : > { %s247_s30 = sand.u32 1, %s2654_s2   ;;  %s2256_s26 = scalar_lea.vmem [#allocation7], %s1580_s0 }
  0x50   : > { %s248_s3 = scalar_lea.sflag [#allocation8], %s247_s30 }
  0x51   : > { %2072 = dma.done.wait (%p2653_p8), %s248_s3, 256  }
  0x52   : > { %2074 = vsyncadd (%p2653_p8), %s248_s3, 4294967040 }
  0x53   : > { %2076 = dma.done.wait (%p2174_p3), [#allocation8], 16  }
  0x54   : > { %2078 = vsyncadd (%p2174_p3), [#allocation8], 4294967280  ;;  %v336_v0 = vld [vmem:[%s2248_s10 + $0xf8] sm:$0xff]  ;;  %v335_v4 = vld [vmem:[%s2248_s10 + $0xf0] sm:$0xff]  ;;  %vm303_vm0 = vcmask 7168   ;;  %v2108_v26 = vmov 0.0   ;;  %v578_v33 = vlaneseq }
  0x55   : > { %v368_v1 = vld [vmem:[%s2248_s10 + $0x1f8] sm:$0xff]  ;;  %1588 = vmatprep.subr.mxu0 %v336_v0  ;;  %v367_v5 = vld [vmem:[%s2248_s10 + $0x1f0] sm:$0xff]  ;;  %v334_v8 = vld [vmem:[%s2248_s10 + $0xe8] sm:$0xff]  ;;  %304 = vst.msk [vmem:[#allocation3] sm:$0xff] %vm303_vm0, %v2108_v26  ;;  %v2109_v31 = vmov 1966171168  }
  0x56   : > { %v320_v2 = vld [vmem:[%s2248_s10 + $0x78] sm:$0xff]  ;;  %1623 = vmatprep.subr.mxu1 %v368_v1  ;;  %v319_v6 = vld [vmem:[%s2248_s10 + $0x70] sm:$0xff]  ;;  %v366_v9 = vld [vmem:[%s2248_s10 + $0x1e8] sm:$0xff]  ;;  %295 = vst [vmem:[#allocation2] sm:$0x1] %v2108_v26  ;;  %v576_v32 = vunpack.c.l.s4 %v2109_v31  ;;  %v2305_v43 = vshrl.u32 %v578_v33, 7 }
  0x57   : > { %v352_v3 = vld [vmem:[%s2248_s10 + $0x178] sm:$0xff]  ;;  %1589 = vmatpush3.msra.mxu0 %v320_v2  ;;  %v351_v7 = vld [vmem:[%s2248_s10 + $0x170] sm:$0xff]  ;;  %v318_v10 = vld [vmem:[%s2248_s10 + $0x68] sm:$0xff]  ;;  %296 = vst [vmem:[#allocation2 + $0x1] sm:$0x1] %v2108_v26  ;;  %vm1308_vm1 = vcmask 1040384  }
  0x58   : > { %1624 = vmatpush3.msra.mxu1 %v352_v3  ;;  %1590 = vmatprep.subr.mxu0 %v335_v4  ;;  %v350_v11 = vld [vmem:[%s2248_s10 + $0x168] sm:$0xff]  ;;  %v333_v12 = vld [vmem:[%s2248_s10 + $0xe0] sm:$0xff]  ;;  %v332_v16 = vld [vmem:[%s2248_s10 + $0xd8] sm:$0xff]  ;;  %297 = vst [vmem:[#allocation2 + $0x2] sm:$0x1] %v2108_v26  ;;  %v577_v42 = vunpack.c.0.s8 %v576_v32  ;;  %v2335_v2 = vsub.s32 1, %v2305_v43 }
  0x59   : > { %1625 = vmatprep.subr.mxu1 %v367_v5  ;;  %1591 = vmatpush3.msra.mxu0 %v319_v6  ;;  %v365_v13 = vld [vmem:[%s2248_s10 + $0x1e0] sm:$0xff]  ;;  %v364_v17 = vld [vmem:[%s2248_s10 + $0x1d8] sm:$0xff]  ;;  %v331_v20 = vld [vmem:[%s2248_s10 + $0xd0] sm:$0xff]  ;;  %298 = vst [vmem:[#allocation2 + $0x3] sm:$0x1] %v2108_v26  ;;  %s1414_s24 = sld [smem:[#allocation4]] }
  0x5a   : > { %1626 = vmatpush3.msra.mxu1 %v351_v7  ;;  %1592 = vmatprep.subr.mxu0 %v334_v8  ;;  %v317_v14 = vld [vmem:[%s2248_s10 + $0x60] sm:$0xff]  ;;  %v316_v18 = vld [vmem:[%s2248_s10 + $0x58] sm:$0xff]  ;;  %v363_v21 = vld [vmem:[%s2248_s10 + $0x1d0] sm:$0xff]  ;;  %299 = vst [vmem:[#allocation2 + $0x4] sm:$0x1] %v2108_v26  ;;  %v580_v53 = vsub.s32 %v577_v42, %v2305_v43  ;;  %p287_p3 = scmp.lt.s32.totalorder %s2093_s20, 1 }
  0x5b   : > { %1627 = vmatprep.subr.mxu1 %v366_v9  ;;  %v349_v15 = vld [vmem:[%s2248_s10 + $0x160] sm:$0xff]  ;;  %1593 = vmatpush3.msra.mxu0 %v318_v10  ;;  %v348_v19 = vld [vmem:[%s2248_s10 + $0x158] sm:$0xff]  ;;  %v315_v22 = vld [vmem:[%s2248_s10 + $0x50] sm:$0xff]  ;;  %300 = vst [vmem:[#allocation2 + $0x5] sm:$0x1] %v2108_v26  ;;  %v2344_v10 = vsub.s32 0, %v2305_v43 }
  0x5c   : > { %1628 = vmatpush3.msra.mxu1 %v350_v11  ;;  %1594 = vmatprep.subr.mxu0 %v333_v12  ;;  %v347_v23 = vld [vmem:[%s2248_s10 + $0x150] sm:$0xff]  ;;  %v330_v24 = vld [vmem:[%s2248_s10 + $0xc8] sm:$0xff]  ;;  %301 = vst [vmem:[#allocation2 + $0x6] sm:$0x1] %v2108_v26  ;;  %302 = vst [vmem:[#allocation2 + $0x7] sm:$0x1] %v2108_v26 }
  0x5d   : > { %1629 = vmatprep.subr.mxu1 %v365_v13  ;;  %1595 = vmatpush3.msra.mxu0 %v317_v14  ;;  %v362_v25 = vld [vmem:[%s2248_s10 + $0x1c8] sm:$0xff]  ;;  %v329_v29 = vld [vmem:[%s2248_s10 + $0xc0] sm:$0xff]  ;;  %v328_v36 = vld [vmem:[%s2248_s10 + $0xb8] sm:$0xff]  ;;  %vm1433_vm2 = vcmask 1041409   ;;  %vm1436_vm3 = vcmask 1042434   ;;  %vm1439_vm4 = vcmask 1043459  }
  0x5e   : > { %1630 = vmatpush3.msra.mxu1 %v349_v15  ;;  %1596 = vmatprep.subr.mxu0 %v332_v16  ;;  %v314_v27 = vld [vmem:[%s2248_s10 + $0x48] sm:$0xff]  ;;  %v361_v30 = vld [vmem:[%s2248_s10 + $0x1c0] sm:$0xff]  ;;  %v360_v37 = vld [vmem:[%s2248_s10 + $0x1b8] sm:$0xff]  ;;  %s2663_s20 = smov (!%p287_p3, %s2093_s20), 1  ;;  %vm1442_vm5 = vcmask 1044484   ;;  %vm1445_vm6 = vcmask 1045509  }
  0x5f   : > { %1631 = vmatprep.subr.mxu1 %v364_v17  ;;  %1597 = vmatpush3.msra.mxu0 %v316_v18  ;;  %v346_v28 = vld [vmem:[%s2248_s10 + $0x148] sm:$0xff]  ;;  %v313_v34 = vld [vmem:[%s2248_s10 + $0x40] sm:$0xff]  ;;  %v312_v38 = vld [vmem:[%s2248_s10 + $0x38] sm:$0xff]  ;;  %s1582_s25 = sshll.u32 %s2663_s20, 3  ;;  %vm1448_vm7 = vcmask 1046534   ;;  %vm1451_vm8 = vcmask 1047559  }
  0x60   : > { %1632 = vmatpush3.msra.mxu1 %v348_v19  ;;  %1598 = vmatprep.subr.mxu0 %v331_v20  ;;  %v345_v35 = vld [vmem:[%s2248_s10 + $0x140] sm:$0xff]  ;;  %v344_v39 = vld [vmem:[%s2248_s10 + $0x138] sm:$0xff]  ;;  %v327_v40 = vld [vmem:[%s2248_s10 + $0xb0] sm:$0xff]  ;;  %s290_s15 = scalar_lea.vmem %s2639_s4, %s1582_s25 }
  0x61   : > { %1633 = vmatprep.subr.mxu1 %v363_v21  ;;  %1599 = vmatpush3.msra.mxu0 %v315_v22  ;;  %v359_v41 = vld [vmem:[%s2248_s10 + $0x1b0] sm:$0xff]  ;;  %v326_v46 = vld [vmem:[%s2248_s10 + $0xa8] sm:$0xff]  ;;  %v325_v50 = vld [vmem:[%s2248_s10 + $0xa0] sm:$0xff] }
  0x62   : > { %1634 = vmatpush3.msra.mxu1 %v347_v23  ;;  %1600 = vmatprep.subr.mxu0 %v330_v24  ;;  %v311_v44 = vld [vmem:[%s2248_s10 + $0x30] sm:$0xff]  ;;  %v358_v47 = vld [vmem:[%s2248_s10 + $0x1a8] sm:$0xff]  ;;  %v357_v51 = vld [vmem:[%s2248_s10 + $0x1a0] sm:$0xff] }
  0x63   : > { %1635 = vmatprep.subr.mxu1 %v362_v25  ;;  %1601 = vmatpush3.msra.mxu0 %v314_v27  ;;  %v343_v45 = vld [vmem:[%s2248_s10 + $0x130] sm:$0xff]  ;;  %v310_v48 = vld [vmem:[%s2248_s10 + $0x28] sm:$0xff]  ;;  %v309_v52 = vld [vmem:[%s2248_s10 + $0x20] sm:$0xff] }
  0x64   : > { %1636 = vmatpush3.msra.mxu1 %v346_v28  ;;  %1602 = vmatprep.subr.mxu0 %v329_v29  ;;  %v342_v49 = vld [vmem:[%s2248_s10 + $0x128] sm:$0xff]  ;;  %v341_v54 = vld [vmem:[%s2248_s10 + $0x120] sm:$0xff]  ;;  %v324_v57 = vld [vmem:[%s2248_s10 + $0x98] sm:$0xff] }
  0x65   : > { %1637 = vmatprep.subr.mxu1 %v361_v30  ;;  %1603 = vmatpush3.msra.mxu0 %v313_v34  ;;  %v2319_v55 = vld [vmem:[%s2256_s26] sm:$0xff]  ;;  %v2322_v56 = vld [vmem:[%s2256_s26 + $0x8] sm:$0xff] }
  0x66   : > { %1638 = vmatpush3.msra.mxu1 %v345_v35  ;;  %1604 = vmatprep.subr.mxu0 %v328_v36  ;;  %v356_v58 = vld [vmem:[%s2248_s10 + $0x198] sm:$0xff]  ;;  %v573_v59 = vcombine.low %v2319_v55, %v2322_v56  ;;  %v574_v60 = vcombine.high %v2319_v55, %v2322_v56  ;;  %v323_v63 = vld [vmem:[%s2248_s10 + $0x90] sm:$0xff]  ;;  %v322_v6 = vld [vmem:[%s2248_s10 + $0x88] sm:$0xff] }
  0x67   : > { %1639 = vmatprep.subr.mxu1 %v360_v37  ;;  %1605 = vmatpush3.msra.mxu0 %v312_v38  ;;  %v308_v61 = vld [vmem:[%s2248_s10 + $0x18] sm:$0xff]  ;;  %v355_v0 = vld [vmem:[%s2248_s10 + $0x190] sm:$0xff]  ;;  %v354_v7 = vld [vmem:[%s2248_s10 + $0x188] sm:$0xff] }
  0x68   : > { %1640 = vmatpush3.msra.mxu1 %v344_v39  ;;  %1606 = vmatprep.subr.mxu0 %v327_v40  ;;  %v340_v62 = vld [vmem:[%s2248_s10 + $0x118] sm:$0xff]  ;;  %v581_v1 = vrot.slane %v573_v59, %v580_v53  ;;  %v588_v3 = vrot.slane %v574_v60, %v580_v53  ;;  %v307_v4 = vld [vmem:[%s2248_s10 + $0x10] sm:$0xff]  ;;  %v306_v12 = vld [vmem:[%s2248_s10 + $0x8] sm:$0xff] }
  0x69   : > { %1641 = vmatprep.subr.mxu1 %v359_v41  ;;  %1607 = vmatpush3.msra.mxu0 %v311_v44  ;;  %v339_v5 = vld [vmem:[%s2248_s10 + $0x110] sm:$0xff]  ;;  %v338_v13 = vld [vmem:[%s2248_s10 + $0x108] sm:$0xff]  ;;  %v321_v15 = vld [vmem:[%s2248_s10 + $0x80] sm:$0xff] }
  0x6a   : > { %1642 = vmatpush3.msra.mxu1 %v343_v45  ;;  %1608 = vmatprep.subr.mxu0 %v326_v46  ;;  %v2341_v8 = vrot.slane %v581_v1, %v580_v53  ;;  %v589_v9 = vcombine.high %v581_v1, %v581_v1  ;;  %v2346_v11 = vrot.slane %v588_v3, %v580_v53  ;;  %v353_v16 = vld [vmem:[%s2248_s10 + $0x180] sm:$0xff]  ;;  %v400_v25 = vld [vmem:[%s2248_s10 + $0x2f8] sm:$0xff]  ;;  %v399_v29 = vld [vmem:[%s2248_s10 + $0x2f0] sm:$0xff] }
  0x6b   : > { %1643 = vmatprep.subr.mxu1 %v358_v47  ;;  %1609 = vmatpush3.msra.mxu0 %v310_v48  ;;  %v590_v14 = vcombine.high %v588_v3, %v588_v3  ;;  %v305_v19 = vld [vmem:[%s2248_s10] sm:$0xff]  ;;  %v432_v26 = vld [vmem:[%s2248_s10 + $0x3f8] sm:$0xff]  ;;  %v431_v30 = vld [vmem:[%s2248_s10 + $0x3f0] sm:$0xff] }
  0x6c   : > { %1644 = vmatpush3.msra.mxu1 %v342_v49  ;;  %1610 = vmatprep.subr.mxu0 %v325_v50  ;;  %v630_v17 = vrot.slane %v2341_v8, %v2335_v2  ;;  %v2354_v18 = vrot.slane %v589_v9, %v580_v53  ;;  %v337_v21 = vld [vmem:[%s2248_s10 + $0x100] sm:$0xff]  ;;  %v626_v23 = vrot.slane %v2341_v8, %v2344_v10  ;;  %v384_v27 = vld [vmem:[%s2248_s10 + $0x278] sm:$0xff]  ;;  %v383_v31 = vld [vmem:[%s2248_s10 + $0x270] sm:$0xff] }
  0x6d   : > { %1645 = vmatprep.subr.mxu1 %v357_v51  ;;  %1611 = vmatpush3.msra.mxu0 %v309_v52  ;;  %v2357_v20 = vrot.slane %v590_v14, %v580_v53  ;;  %v416_v28 = vld [vmem:[%s2248_s10 + $0x378] sm:$0xff]  ;;  %v415_v32 = vld [vmem:[%s2248_s10 + $0x370] sm:$0xff]  ;;  %v398_v33 = vld [vmem:[%s2248_s10 + $0x2e8] sm:$0xff] }
  0x6e   : > { %1646 = vmatpush3.msra.mxu1 %v341_v54  ;;  %1612 = vmatprep.subr.mxu0 %v324_v57  ;;  %v710_v22 = vrot.slane %v2354_v18, %v2335_v2  ;;  %v706_v24 = vrot.slane %v2354_v18, %v2344_v10  ;;  %v430_v34 = vld [vmem:[%s2248_s10 + $0x3e8] sm:$0xff]  ;;  %v397_v37 = vld [vmem:[%s2248_s10 + $0x2e0] sm:$0xff]  ;;  %v396_v41 = vld [vmem:[%s2248_s10 + $0x2d8] sm:$0xff]  ;;  %v1280_v54 = vadd.f32 %v2322_v56, %v2319_v55 }
  0x6f   : > { %1647 = vmatprep.subr.mxu1 %v356_v58  ;;  %1613 = vmatpush3.msra.mxu0 %v308_v61  ;;  %v382_v35 = vld [vmem:[%s2248_s10 + $0x268] sm:$0xff]  ;;  %v429_v38 = vld [vmem:[%s2248_s10 + $0x3e0] sm:$0xff]  ;;  %v428_v42 = vld [vmem:[%s2248_s10 + $0x3d8] sm:$0xff] }
  0x70   : > { %1648 = vmatpush3.msra.mxu1 %v340_v62  ;;  %1614 = vmatprep.subr.mxu0 %v323_v63  ;;  %v414_v36 = vld [vmem:[%s2248_s10 + $0x368] sm:$0xff]  ;;  %v381_v39 = vld [vmem:[%s2248_s10 + $0x260] sm:$0xff]  ;;  %v380_v44 = vld [vmem:[%s2248_s10 + $0x258] sm:$0xff] }
  0x71   : > { %1649 = vmatprep.subr.mxu1 %v355_v0  ;;  %1615 = vmatpush3.msra.mxu0 %v307_v4  ;;  %v413_v40 = vld [vmem:[%s2248_s10 + $0x360] sm:$0xff]  ;;  %v412_v45 = vld [vmem:[%s2248_s10 + $0x358] sm:$0xff]  ;;  %v395_v46 = vld [vmem:[%s2248_s10 + $0x2d0] sm:$0xff] }
  0x72   : > { %1650 = vmatpush3.msra.mxu1 %v339_v5  ;;  %1616 = vmatprep.subr.mxu0 %v322_v6  ;;  %v427_v47 = vld [vmem:[%s2248_s10 + $0x3d0] sm:$0xff]  ;;  %v394_v50 = vld [vmem:[%s2248_s10 + $0x2c8] sm:$0xff]  ;;  %v393_v57 = vld [vmem:[%s2248_s10 + $0x2c0] sm:$0xff] }
  0x73   : > { %1651 = vmatprep.subr.mxu1 %v354_v7  ;;  %1617 = vmatpush3.msra.mxu0 %v306_v12  ;;  %v379_v48 = vld [vmem:[%s2248_s10 + $0x250] sm:$0xff]  ;;  %v426_v51 = vld [vmem:[%s2248_s10 + $0x3c8] sm:$0xff]  ;;  %v425_v58 = vld [vmem:[%s2248_s10 + $0x3c0] sm:$0xff] }
  0x74   : > { %1652 = vmatpush3.msra.mxu1 %v338_v13  ;;  %1618 = vmatprep.subr.mxu0 %v321_v15  ;;  %v411_v49 = vld [vmem:[%s2248_s10 + $0x350] sm:$0xff]  ;;  %v378_v52 = vld [vmem:[%s2248_s10 + $0x248] sm:$0xff]  ;;  %v377_v59 = vld [vmem:[%s2248_s10 + $0x240] sm:$0xff] }
  0x75   : > { %1653 = vmatprep.subr.mxu1 %v353_v16  ;;  %1619 = vmatpush3.msra.mxu0 %v305_v19  ;;  %v410_v53 = vld [vmem:[%s2248_s10 + $0x348] sm:$0xff]  ;;  %v409_v60 = vld [vmem:[%s2248_s10 + $0x340] sm:$0xff]  ;;  %v392_v61 = vld [vmem:[%s2248_s10 + $0x2b8] sm:$0xff] }
  0x76   : > { %697 = vmatprep.mubr.f32.mxu0 %v630_v17  ;;  %1654 = vmatpush3.msra.mxu1 %v337_v21  ;;  %v424_v55 = vld [vmem:[%s2248_s10 + $0x3b8] sm:$0xff]  ;;  %v391_v63 = vld [vmem:[%s2248_s10 + $0x2b0] sm:$0xff]  ;;  %v390_v4 = vld [vmem:[%s2248_s10 + $0x2a8] sm:$0xff] }
  0x77   : > { %777 = vmatprep.mubr.f32.mxu1 %v710_v22  ;;  %698 = vmatmul.mubr.f32.vlgmr.msra.gmra.mxu0 %v626_v23  ;;  %v376_v56 = vld [vmem:[%s2248_s10 + $0x238] sm:$0xff]  ;;  %v423_v0 = vld [vmem:[%s2248_s10 + $0x3b0] sm:$0xff]  ;;  %v422_v5 = vld [vmem:[%s2248_s10 + $0x3a8] sm:$0xff] }
  0x78   : > { %778 = vmatmul.mubr.f32.vlgmr.msra.gmra.mxu1 %v706_v24  ;;  %1658 = vmatprep.subr.mxu0 %v400_v25  ;;  %v408_v62 = vld [vmem:[%s2248_s10 + $0x338] sm:$0xff]  ;;  %v375_v1 = vld [vmem:[%s2248_s10 + $0x230] sm:$0xff]  ;;  %v374_v6 = vld [vmem:[%s2248_s10 + $0x228] sm:$0xff]  ;;  %v619_v24 = vcombine.high %v2341_v8, %v2341_v8 }
  0x79   : > { %1693 = vmatprep.subr.mxu1 %v432_v26  ;;  %1659 = vmatpush3.msra.mxu0 %v384_v27  ;;  %v407_v3 = vld [vmem:[%s2248_s10 + $0x330] sm:$0xff]  ;;  %v406_v7 = vld [vmem:[%s2248_s10 + $0x328] sm:$0xff]  ;;  %v389_v9 = vld [vmem:[%s2248_s10 + $0x2a0] sm:$0xff]  ;;  %v621_v27 = vcombine.high %v2354_v18, %v2354_v18 }
  0x7a   : > { %1694 = vmatpush3.msra.mxu1 %v416_v28  ;;  %1660 = vmatprep.subr.mxu0 %v399_v29  ;;  %v421_v12 = vld [vmem:[%s2248_s10 + $0x3a0] sm:$0xff]  ;;  %v388_v15 = vld [vmem:[%s2248_s10 + $0x298] sm:$0xff]  ;;  %v387_v21 = vld [vmem:[%s2248_s10 + $0x290] sm:$0xff] }
  0x7b   : > { %1695 = vmatprep.subr.mxu1 %v431_v30  ;;  %1661 = vmatpush3.msra.mxu0 %v383_v31  ;;  %v373_v13 = vld [vmem:[%s2248_s10 + $0x220] sm:$0xff]  ;;  %v420_v16 = vld [vmem:[%s2248_s10 + $0x398] sm:$0xff]  ;;  %v419_v22 = vld [vmem:[%s2248_s10 + $0x390] sm:$0xff] }
  0x7c   : > { %1696 = vmatpush3.msra.mxu1 %v415_v32  ;;  %1662 = vmatprep.subr.mxu0 %v398_v33  ;;  %v405_v14 = vld [vmem:[%s2248_s10 + $0x320] sm:$0xff]  ;;  %v372_v17 = vld [vmem:[%s2248_s10 + $0x218] sm:$0xff]  ;;  %v371_v23 = vld [vmem:[%s2248_s10 + $0x210] sm:$0xff]  ;;  %v790_v33 = vrot.slane %v619_v24, %v2335_v2 }
  0x7d   : > { %1697 = vmatprep.subr.mxu1 %v430_v34  ;;  %1663 = vmatpush3.msra.mxu0 %v382_v35  ;;  %v404_v19 = vld [vmem:[%s2248_s10 + $0x318] sm:$0xff]  ;;  %v403_v25 = vld [vmem:[%s2248_s10 + $0x310] sm:$0xff]  ;;  %v386_v26 = vld [vmem:[%s2248_s10 + $0x288] sm:$0xff]  ;;  %v870_v34 = vrot.slane %v621_v27, %v2335_v2  ;;  %v786_v35 = vrot.slane %v619_v24, %v2344_v10 }
  0x7e   : > { %1698 = vmatpush3.msra.mxu1 %v414_v36  ;;  %1664 = vmatprep.subr.mxu0 %v397_v37  ;;  %v418_v28 = vld [vmem:[%s2248_s10 + $0x388] sm:$0xff]  ;;  %v385_v31 = vld [vmem:[%s2248_s10 + $0x280] sm:$0xff]  ;;  %v866_v36 = vrot.slane %v621_v27, %v2344_v10  ;;  %v464_v37 = vld [vmem:[%s2248_s10 + $0x4f8] sm:$0xff] }
  0x7f   : > { %1699 = vmatprep.subr.mxu1 %v429_v38  ;;  %1665 = vmatpush3.msra.mxu0 %v381_v39  ;;  %v370_v29 = vld [vmem:[%s2248_s10 + $0x208] sm:$0xff]  ;;  %v417_v8 = vld [vmem:[%s2248_s10 + $0x380] sm:$0xff]  ;;  %v496_v38 = vld [vmem:[%s2248_s10 + $0x5f8] sm:$0xff] }
  0x80   : > { %1700 = vmatpush3.msra.mxu1 %v413_v40  ;;  %1666 = vmatprep.subr.mxu0 %v396_v41  ;;  %v402_v30 = vld [vmem:[%s2248_s10 + $0x308] sm:$0xff]  ;;  %v369_v32 = vld [vmem:[%s2248_s10 + $0x200] sm:$0xff]  ;;  %v448_v39 = vld [vmem:[%s2248_s10 + $0x478] sm:$0xff] }
  0x81   : > { %1701 = vmatprep.subr.mxu1 %v428_v42  ;;  %1667 = vmatpush3.msra.mxu0 %v380_v44  ;;  %v401_v18 = vld [vmem:[%s2248_s10 + $0x300] sm:$0xff]  ;;  %v480_v40 = vld [vmem:[%s2248_s10 + $0x578] sm:$0xff]  ;;  %v463_v41 = vld [vmem:[%s2248_s10 + $0x4f0] sm:$0xff] }
  0x82   : > { %1702 = vmatpush3.msra.mxu1 %v412_v45  ;;  %1668 = vmatprep.subr.mxu0 %v395_v46  ;;  %v495_v42 = vld [vmem:[%s2248_s10 + $0x5f0] sm:$0xff]  ;;  %v462_v46 = vld [vmem:[%s2248_s10 + $0x4e8] sm:$0xff]  ;;  %v453_v24 = vld [vmem:[%s2248_s10 + $0x4a0] sm:$0xff] }
  0x83   : > { %1703 = vmatprep.subr.mxu1 %v427_v47  ;;  %1669 = vmatpush3.msra.mxu0 %v379_v48  ;;  %v447_v44 = vld [vmem:[%s2248_s10 + $0x470] sm:$0xff]  ;;  %v494_v47 = vld [vmem:[%s2248_s10 + $0x5e8] sm:$0xff]  ;;  %v469_v27 = vld [vmem:[%s2248_s10 + $0x520] sm:$0xff] }
  0x84   : > { %1704 = vmatpush3.msra.mxu1 %v411_v49  ;;  %1670 = vmatprep.subr.mxu0 %v394_v50  ;;  %v479_v45 = vld [vmem:[%s2248_s10 + $0x570] sm:$0xff]  ;;  %v446_v48 = vld [vmem:[%s2248_s10 + $0x468] sm:$0xff]  ;;  %v461_v50 = vld [vmem:[%s2248_s10 + $0x4e0] sm:$0xff] }
  0x85   : > { %1705 = vmatprep.subr.mxu1 %v426_v51  ;;  %1671 = vmatpush3.msra.mxu0 %v378_v52  ;;  %v478_v49 = vld [vmem:[%s2248_s10 + $0x568] sm:$0xff]  ;;  %v493_v51 = vld [vmem:[%s2248_s10 + $0x5e0] sm:$0xff] }
  0x86   : > { %1706 = vmatpush3.msra.mxu1 %v410_v53  ;;  %1281 = vadd.xlane.f32.xlu0 %v1280_v54  ;;  %v445_v52 = vld [vmem:[%s2248_s10 + $0x460] sm:$0xff]  ;;  %v460_v54 = vld [vmem:[%s2248_s10 + $0x4d8] sm:$0xff] }
  0x87   : > { %1672 = vmatprep.subr.mxu0 %v393_v57  ;;  %1707 = vmatprep.subr.mxu1 %v425_v58  ;;  %v477_v53 = vld [vmem:[%s2248_s10 + $0x560] sm:$0xff]  ;;  %v492_v57 = vld [vmem:[%s2248_s10 + $0x5d8] sm:$0xff] }
  0x88   : > { %1673 = vmatpush3.msra.mxu0 %v377_v59  ;;  %1708 = vmatpush3.msra.mxu1 %v409_v60  ;;  %v444_v58 = vld [vmem:[%s2248_s10 + $0x458] sm:$0xff]  ;;  %v459_v60 = vld [vmem:[%s2248_s10 + $0x4d0] sm:$0xff] }
  0x89   : > { %1674 = vmatprep.subr.mxu0 %v392_v61  ;;  %1709 = vmatprep.subr.mxu1 %v424_v55  ;;  %v476_v59 = vld [vmem:[%s2248_s10 + $0x558] sm:$0xff]  ;;  %v491_v61 = vld [vmem:[%s2248_s10 + $0x5d0] sm:$0xff] }
  0x8a   : > { %1675 = vmatpush3.msra.mxu0 %v376_v56  ;;  %1710 = vmatpush3.msra.mxu1 %v408_v62  ;;  %v443_v55 = vld [vmem:[%s2248_s10 + $0x450] sm:$0xff]  ;;  %v458_v62 = vld [vmem:[%s2248_s10 + $0x4c8] sm:$0xff] }
  0x8b   : > { %1676 = vmatprep.subr.mxu0 %v391_v63  ;;  %1711 = vmatprep.subr.mxu1 %v423_v0  ;;  %v475_v56 = vld [vmem:[%s2248_s10 + $0x550] sm:$0xff]  ;;  %v490_v63 = vld [vmem:[%s2248_s10 + $0x5c8] sm:$0xff] }
  0x8c   : > { %1677 = vmatpush3.msra.mxu0 %v375_v1  ;;  %1712 = vmatpush3.msra.mxu1 %v407_v3  ;;  %v442_v0 = vld [vmem:[%s2248_s10 + $0x448] sm:$0xff]  ;;  %v457_v3 = vld [vmem:[%s2248_s10 + $0x4c0] sm:$0xff] }
  0x8d   : > { %1678 = vmatprep.subr.mxu0 %v390_v4  ;;  %1713 = vmatprep.subr.mxu1 %v422_v5  ;;  %v474_v1 = vld [vmem:[%s2248_s10 + $0x548] sm:$0xff]  ;;  %v489_v4 = vld [vmem:[%s2248_s10 + $0x5c0] sm:$0xff] }
  0x8e   : > { %1679 = vmatpush3.msra.mxu0 %v374_v6  ;;  %1714 = vmatpush3.msra.mxu1 %v406_v7  ;;  %v441_v5 = vld [vmem:[%s2248_s10 + $0x440] sm:$0xff]  ;;  %v456_v7 = vld [vmem:[%s2248_s10 + $0x4b8] sm:$0xff] }
  0x8f   : > { %1680 = vmatprep.subr.mxu0 %v389_v9  ;;  %1715 = vmatprep.subr.mxu1 %v421_v12  ;;  %v473_v6 = vld [vmem:[%s2248_s10 + $0x540] sm:$0xff]  ;;  %v488_v9 = vld [vmem:[%s2248_s10 + $0x5b8] sm:$0xff] }
  0x90   : > { %1681 = vmatpush3.msra.mxu0 %v373_v13  ;;  %1716 = vmatpush3.msra.mxu1 %v405_v14  ;;  %v440_v12 = vld [vmem:[%s2248_s10 + $0x438] sm:$0xff]  ;;  %v455_v14 = vld [vmem:[%s2248_s10 + $0x4b0] sm:$0xff] }
  0x91   : > { %1682 = vmatprep.subr.mxu0 %v388_v15  ;;  %1717 = vmatprep.subr.mxu1 %v420_v16  ;;  %v472_v13 = vld [vmem:[%s2248_s10 + $0x538] sm:$0xff]  ;;  %v487_v15 = vld [vmem:[%s2248_s10 + $0x5b0] sm:$0xff] }
  0x92   : > { %1683 = vmatpush3.msra.mxu0 %v372_v17  ;;  %1718 = vmatpush3.msra.mxu1 %v404_v19  ;;  %v439_v16 = vld [vmem:[%s2248_s10 + $0x430] sm:$0xff]  ;;  %v454_v19 = vld [vmem:[%s2248_s10 + $0x4a8] sm:$0xff] }
  0x93   : > { %1684 = vmatprep.subr.mxu0 %v387_v21  ;;  %1719 = vmatprep.subr.mxu1 %v419_v22  ;;  %v471_v17 = vld [vmem:[%s2248_s10 + $0x530] sm:$0xff]  ;;  %v486_v21 = vld [vmem:[%s2248_s10 + $0x5a8] sm:$0xff] }
  0x94   : > { %1685 = vmatpush3.msra.mxu0 %v371_v23  ;;  %1720 = vmatpush3.msra.mxu1 %v403_v25  ;;  %v438_v22 = vld [vmem:[%s2248_s10 + $0x428] sm:$0xff]  ;;  %v485_v25 = vld [vmem:[%s2248_s10 + $0x5a0] sm:$0xff] }
  0x95   : > { %1686 = vmatprep.subr.mxu0 %v386_v26  ;;  %1721 = vmatprep.subr.mxu1 %v418_v28  ;;  %v470_v23 = vld [vmem:[%s2248_s10 + $0x528] sm:$0xff]  ;;  %v437_v26 = vld [vmem:[%s2248_s10 + $0x420] sm:$0xff]  ;;  %v452_v28 = vld [vmem:[%s2248_s10 + $0x498] sm:$0xff] }
  0x96   : > { %1687 = vmatpush3.msra.mxu0 %v370_v29  ;;  %1722 = vmatpush3.msra.mxu1 %v402_v30  ;;  %v484_v29 = vld [vmem:[%s2248_s10 + $0x598] sm:$0xff] }
  0x97   : > { %1688 = vmatprep.subr.mxu0 %v385_v31  ;;  %1723 = vmatprep.subr.mxu1 %v417_v8  ;;  %v436_v30 = vld [vmem:[%s2248_s10 + $0x418] sm:$0xff]  ;;  %v451_v8 = vld [vmem:[%s2248_s10 + $0x490] sm:$0xff] }
  0x98   : > { %1689 = vmatpush3.msra.mxu0 %v369_v32  ;;  %857 = vmatprep.mubr.f32.mxu0 %v790_v33  ;;  %v468_v31 = vld [vmem:[%s2248_s10 + $0x518] sm:$0xff]  ;;  %v483_v32 = vld [vmem:[%s2248_s10 + $0x590] sm:$0xff] }
  0x99   : > { %1724 = vmatpush3.msra.mxu1 %v401_v18  ;;  %937 = vmatprep.mubr.f32.mxu1 %v870_v34  ;;  %v435_v33 = vld [vmem:[%s2248_s10 + $0x410] sm:$0xff]  ;;  %v450_v34 = vld [vmem:[%s2248_s10 + $0x488] sm:$0xff] }
  0x9a   : > { %858 = vmatmul.mubr.f32.vlgmr.msra.gmra.mxu0 %v786_v35  ;;  %938 = vmatmul.mubr.f32.vlgmr.msra.gmra.mxu1 %v866_v36  ;;  %v467_v18 = vld [vmem:[%s2248_s10 + $0x510] sm:$0xff]  ;;  %v482_v35 = vld [vmem:[%s2248_s10 + $0x588] sm:$0xff] }
  0x9b   : > { %1728 = vmatprep.subr.mxu0 %v464_v37  ;;  %1763 = vmatprep.subr.mxu1 %v496_v38  ;;  %v434_v36 = vld [vmem:[%s2248_s10 + $0x408] sm:$0xff]  ;;  %v449_v38 = vld [vmem:[%s2248_s10 + $0x480] sm:$0xff] }
  0x9c   : > { %1729 = vmatpush3.msra.mxu0 %v448_v39  ;;  %1764 = vmatpush3.msra.mxu1 %v480_v40  ;;  %v466_v37 = vld [vmem:[%s2248_s10 + $0x508] sm:$0xff]  ;;  %v481_v39 = vld [vmem:[%s2248_s10 + $0x580] sm:$0xff] }
  0x9d   : > { %1730 = vmatprep.subr.mxu0 %v463_v41  ;;  %1765 = vmatprep.subr.mxu1 %v495_v42  ;;  %v433_v40 = vld [vmem:[%s2248_s10 + $0x400] sm:$0xff]  ;;  %v950_v41 = vrot.slane %v2346_v11, %v2335_v2 }
  0x9e   : > { %1731 = vmatpush3.msra.mxu0 %v447_v44  ;;  %1766 = vmatpush3.msra.mxu1 %v479_v45  ;;  %v465_v42 = vld [vmem:[%s2248_s10 + $0x500] sm:$0xff]  ;;  %v1030_v44 = vrot.slane %v2357_v20, %v2335_v2  ;;  %v946_v45 = vrot.slane %v2346_v11, %v2344_v10 }
  0x9f   : > { %1732 = vmatprep.subr.mxu0 %v462_v46  ;;  %1767 = vmatprep.subr.mxu1 %v494_v47  ;;  %v1026_v46 = vrot.slane %v2357_v20, %v2344_v10  ;;  %v528_v47 = vld [vmem:[%s2248_s10 + $0x6f8] sm:$0xff] }
  0xa0   : > { %1733 = vmatpush3.msra.mxu0 %v446_v48  ;;  %1768 = vmatpush3.msra.mxu1 %v478_v49  ;;  %v560_v48 = vld [vmem:[%s2248_s10 + $0x7f8] sm:$0xff] }
  0xa1   : > { %1734 = vmatprep.subr.mxu0 %v461_v50  ;;  %1769 = vmatprep.subr.mxu1 %v493_v51  ;;  %v512_v49 = vld [vmem:[%s2248_s10 + $0x678] sm:$0xff]  ;;  %v527_v51 = vld [vmem:[%s2248_s10 + $0x6f0] sm:$0xff] }
  0xa2   : > { %1735 = vmatpush3.msra.mxu0 %v445_v52  ;;  %1770 = vmatpush3.msra.mxu1 %v477_v53  ;;  %v544_v50 = vld [vmem:[%s2248_s10 + $0x778] sm:$0xff]  ;;  %v559_v52 = vld [vmem:[%s2248_s10 + $0x7f0] sm:$0xff] }
  0xa3   : > { %1736 = vmatprep.subr.mxu0 %v460_v54  ;;  %1771 = vmatprep.subr.mxu1 %v492_v57  ;;  %v511_v53 = vld [vmem:[%s2248_s10 + $0x670] sm:$0xff]  ;;  %v526_v57 = vld [vmem:[%s2248_s10 + $0x6e8] sm:$0xff] }
  0xa4   : > { %1737 = vmatpush3.msra.mxu0 %v444_v58  ;;  %1772 = vmatpush3.msra.mxu1 %v476_v59  ;;  %v543_v54 = vld [vmem:[%s2248_s10 + $0x770] sm:$0xff]  ;;  %v558_v58 = vld [vmem:[%s2248_s10 + $0x7e8] sm:$0xff] }
  0xa5   : > { %1738 = vmatprep.subr.mxu0 %v459_v60  ;;  %1773 = vmatprep.subr.mxu1 %v491_v61  ;;  %v510_v59 = vld [vmem:[%s2248_s10 + $0x668] sm:$0xff]  ;;  %v525_v61 = vld [vmem:[%s2248_s10 + $0x6e0] sm:$0xff] }
  0xa6   : > { %1739 = vmatpush3.msra.mxu0 %v443_v55  ;;  %1774 = vmatpush3.msra.mxu1 %v475_v56  ;;  %v542_v60 = vld [vmem:[%s2248_s10 + $0x768] sm:$0xff]  ;;  %v557_v55 = vld [vmem:[%s2248_s10 + $0x7e0] sm:$0xff] }
  0xa7   : > { %1740 = vmatprep.subr.mxu0 %v458_v62  ;;  %1775 = vmatprep.subr.mxu1 %v490_v63  ;;  %v509_v56 = vld [vmem:[%s2248_s10 + $0x660] sm:$0xff]  ;;  %v524_v63 = vld [vmem:[%s2248_s10 + $0x6d8] sm:$0xff] }
  0xa8   : > { %1741 = vmatpush3.msra.mxu0 %v442_v0  ;;  %1776 = vmatpush3.msra.mxu1 %v474_v1  ;;  %v541_v62 = vld [vmem:[%s2248_s10 + $0x760] sm:$0xff]  ;;  %v556_v0 = vld [vmem:[%s2248_s10 + $0x7d8] sm:$0xff] }
  0xa9   : > { %1742 = vmatprep.subr.mxu0 %v457_v3  ;;  %1777 = vmatprep.subr.mxu1 %v489_v4  ;;  %v508_v1 = vld [vmem:[%s2248_s10 + $0x658] sm:$0xff]  ;;  %v523_v4 = vld [vmem:[%s2248_s10 + $0x6d0] sm:$0xff] }
  0xaa   : > { %1743 = vmatpush3.msra.mxu0 %v441_v5  ;;  %1778 = vmatpush3.msra.mxu1 %v473_v6  ;;  %v540_v3 = vld [vmem:[%s2248_s10 + $0x758] sm:$0xff]  ;;  %v555_v5 = vld [vmem:[%s2248_s10 + $0x7d0] sm:$0xff] }
  0xab   : > { %1744 = vmatprep.subr.mxu0 %v456_v7  ;;  %1779 = vmatprep.subr.mxu1 %v488_v9  ;;  %v507_v6 = vld [vmem:[%s2248_s10 + $0x650] sm:$0xff]  ;;  %v522_v9 = vld [vmem:[%s2248_s10 + $0x6c8] sm:$0xff] }
  0xac   : > { %1745 = vmatpush3.msra.mxu0 %v440_v12  ;;  %1780 = vmatpush3.msra.mxu1 %v472_v13  ;;  %v539_v7 = vld [vmem:[%s2248_s10 + $0x750] sm:$0xff]  ;;  %v554_v12 = vld [vmem:[%s2248_s10 + $0x7c8] sm:$0xff] }
  0xad   : > { %1746 = vmatprep.subr.mxu0 %v455_v14  ;;  %1781 = vmatprep.subr.mxu1 %v487_v15  ;;  %v506_v13 = vld [vmem:[%s2248_s10 + $0x648] sm:$0xff]  ;;  %v521_v15 = vld [vmem:[%s2248_s10 + $0x6c0] sm:$0xff] }
  0xae   : > { %1747 = vmatpush3.msra.mxu0 %v439_v16  ;;  %1782 = vmatpush3.msra.mxu1 %v471_v17  ;;  %v538_v14 = vld [vmem:[%s2248_s10 + $0x748] sm:$0xff]  ;;  %v553_v16 = vld [vmem:[%s2248_s10 + $0x7c0] sm:$0xff] }
  0xaf   : > { %1748 = vmatprep.subr.mxu0 %v454_v19  ;;  %1783 = vmatprep.subr.mxu1 %v486_v21  ;;  %v505_v17 = vld [vmem:[%s2248_s10 + $0x640] sm:$0xff]  ;;  %v520_v21 = vld [vmem:[%s2248_s10 + $0x6b8] sm:$0xff] }
  0xb0   : > { %1749 = vmatpush3.msra.mxu0 %v438_v22  ;;  %1784 = vmatpush3.msra.mxu1 %v470_v23  ;;  %v537_v19 = vld [vmem:[%s2248_s10 + $0x740] sm:$0xff]  ;;  %v552_v22 = vld [vmem:[%s2248_s10 + $0x7b8] sm:$0xff] }
  0xb1   : > { %1750 = vmatprep.subr.mxu0 %v453_v24  ;;  %1785 = vmatprep.subr.mxu1 %v485_v25  ;;  %v504_v23 = vld [vmem:[%s2248_s10 + $0x638] sm:$0xff]  ;;  %v519_v25 = vld [vmem:[%s2248_s10 + $0x6b0] sm:$0xff] }
  0xb2   : > { %1751 = vmatpush3.msra.mxu0 %v437_v26  ;;  %1786 = vmatpush3.msra.mxu1 %v469_v27  ;;  %v536_v24 = vld [vmem:[%s2248_s10 + $0x738] sm:$0xff]  ;;  %v551_v26 = vld [vmem:[%s2248_s10 + $0x7b0] sm:$0xff] }
  0xb3   : > { %1752 = vmatprep.subr.mxu0 %v452_v28  ;;  %1787 = vmatprep.subr.mxu1 %v484_v29  ;;  %v503_v27 = vld [vmem:[%s2248_s10 + $0x630] sm:$0xff]  ;;  %v518_v29 = vld [vmem:[%s2248_s10 + $0x6a8] sm:$0xff] }
  0xb4   : > { %1753 = vmatpush3.msra.mxu0 %v436_v30  ;;  %1788 = vmatpush3.msra.mxu1 %v468_v31  ;;  %v535_v28 = vld [vmem:[%s2248_s10 + $0x730] sm:$0xff]  ;;  %v550_v30 = vld [vmem:[%s2248_s10 + $0x7a8] sm:$0xff] }
  0xb5   : > { %1754 = vmatprep.subr.mxu0 %v451_v8  ;;  %1789 = vmatprep.subr.mxu1 %v483_v32  ;;  %v502_v31 = vld [vmem:[%s2248_s10 + $0x628] sm:$0xff]  ;;  %v517_v32 = vld [vmem:[%s2248_s10 + $0x6a0] sm:$0xff] }
  0xb6   : > { %1755 = vmatpush3.msra.mxu0 %v435_v33  ;;  %1790 = vmatpush3.msra.mxu1 %v467_v18  ;;  %v534_v8 = vld [vmem:[%s2248_s10 + $0x728] sm:$0xff]  ;;  %v549_v33 = vld [vmem:[%s2248_s10 + $0x7a0] sm:$0xff] }
  0xb7   : > { %1756 = vmatprep.subr.mxu0 %v450_v34  ;;  %1791 = vmatprep.subr.mxu1 %v482_v35  ;;  %v501_v18 = vld [vmem:[%s2248_s10 + $0x620] sm:$0xff]  ;;  %v516_v35 = vld [vmem:[%s2248_s10 + $0x698] sm:$0xff] }
  0xb8   : > { %1757 = vmatpush3.msra.mxu0 %v434_v36  ;;  %1792 = vmatpush3.msra.mxu1 %v466_v37  ;;  %v533_v34 = vld [vmem:[%s2248_s10 + $0x720] sm:$0xff]  ;;  %v548_v36 = vld [vmem:[%s2248_s10 + $0x798] sm:$0xff] }
  0xb9   : > { %1758 = vmatprep.subr.mxu0 %v449_v38  ;;  %1793 = vmatprep.subr.mxu1 %v481_v39  ;;  %v500_v37 = vld [vmem:[%s2248_s10 + $0x618] sm:$0xff]  ;;  %v515_v39 = vld [vmem:[%s2248_s10 + $0x690] sm:$0xff] }
  0xba   : > { %1759 = vmatpush3.msra.mxu0 %v433_v40  ;;  %1017 = vmatprep.mubr.f32.mxu0 %v950_v41  ;;  %v532_v38 = vld [vmem:[%s2248_s10 + $0x718] sm:$0xff]  ;;  %v547_v40 = vld [vmem:[%s2248_s10 + $0x790] sm:$0xff] }
  0xbb   : > { %1794 = vmatpush3.msra.mxu1 %v465_v42  ;;  %1097 = vmatprep.mubr.f32.mxu1 %v1030_v44  ;;  %v499_v41 = vld [vmem:[%s2248_s10 + $0x610] sm:$0xff]  ;;  %v620_v42 = vcombine.high %v2346_v11, %v2346_v11  ;;  %v545_v11 = vld [vmem:[%s2248_s10 + $0x780] sm:$0xff] }
  0xbc   : > { %1018 = vmatmul.mubr.f32.vlgmr.msra.gmra.mxu0 %v946_v45  ;;  %1098 = vmatmul.mubr.f32.vlgmr.msra.gmra.mxu1 %v1026_v46  ;;  %v531_v44 = vld [vmem:[%s2248_s10 + $0x710] sm:$0xff]  ;;  %v514_v45 = vld [vmem:[%s2248_s10 + $0x688] sm:$0xff]  ;;  %v622_v46 = vcombine.high %v2357_v20, %v2357_v20 }
  0xbd   : > { %1798 = vmatprep.subr.mxu0 %v528_v47  ;;  %1833 = vmatprep.subr.mxu1 %v560_v48  ;;  %v546_v47 = vld [vmem:[%s2248_s10 + $0x788] sm:$0xff] }
  0xbe   : > { %1799 = vmatpush3.msra.mxu0 %v512_v49  ;;  %1834 = vmatpush3.msra.mxu1 %v544_v50  ;;  %v498_v48 = vld [vmem:[%s2248_s10 + $0x608] sm:$0xff]  ;;  %v513_v50 = vld [vmem:[%s2248_s10 + $0x680] sm:$0xff]  ;;  %v1190_v20 = vrot.slane %v622_v46, %v2335_v2 }
  0xbf   : > { %1800 = vmatprep.subr.mxu0 %v527_v51  ;;  %1835 = vmatprep.subr.mxu1 %v559_v52  ;;  %v530_v49 = vld [vmem:[%s2248_s10 + $0x708] sm:$0xff]  ;;  %v497_v51 = vld [vmem:[%s2248_s10 + $0x600] sm:$0xff]  ;;  %v1110_v52 = vrot.slane %v620_v42, %v2335_v2 }
  0xc0   : > { %1801 = vmatpush3.msra.mxu0 %v511_v53  ;;  %1836 = vmatpush3.msra.mxu1 %v543_v54  ;;  %v529_v53 = vld [vmem:[%s2248_s10 + $0x700] sm:$0xff]  ;;  %v1106_v54 = vrot.slane %v620_v42, %v2344_v10 }
  0xc1   : > { %1802 = vmatprep.subr.mxu0 %v526_v57  ;;  %1837 = vmatprep.subr.mxu1 %v558_v58  ;;  %v1186_v57 = vrot.slane %v622_v46, %v2344_v10  ;;  %v1279_v58 = vld [vmem:[#allocation3] sm:$0xff] }
  0xc2   : > { %1803 = vmatpush3.msra.mxu0 %v510_v59  ;;  %1838 = vmatpush3.msra.mxu1 %v542_v60 }
  0xc3   : > { %1804 = vmatprep.subr.mxu0 %v525_v61  ;;  %1839 = vmatprep.subr.mxu1 %v557_v55  ;;  %v1350_v61 = vsub.s32 2, %v2305_v43 }
  0xc4   : > { %1805 = vmatpush3.msra.mxu0 %v509_v56  ;;  %1840 = vmatpush3.msra.mxu1 %v541_v62  ;;  %v1364_v62 = vsub.s32 4, %v2305_v43 }
  0xc5   : > { %1806 = vmatprep.subr.mxu0 %v524_v63  ;;  %1841 = vmatprep.subr.mxu1 %v556_v0 }
  0xc6   : > { %1807 = vmatpush3.msra.mxu0 %v508_v1  ;;  %1842 = vmatpush3.msra.mxu1 %v540_v3  ;;  %v1378_v3 = vsub.s32 6, %v2305_v43 }
  0xc7   : > { %1808 = vmatprep.subr.mxu0 %v523_v4  ;;  %1843 = vmatprep.subr.mxu1 %v555_v5  ;;  %v1357_v5 = vsub.s32 3, %v2305_v43 }
  0xc8   : > { %1809 = vmatpush3.msra.mxu0 %v507_v6  ;;  %1844 = vmatpush3.msra.mxu1 %v539_v7 }
  0xc9   : > { %1810 = vmatprep.subr.mxu0 %v522_v9  ;;  %1845 = vmatprep.subr.mxu1 %v554_v12  ;;  %v1371_v9 = vsub.s32 5, %v2305_v43 }
  0xca   : > { %1811 = vmatpush3.msra.mxu0 %v506_v13  ;;  %1846 = vmatpush3.msra.mxu1 %v538_v14 }
  0xcb   : > { %1812 = vmatprep.subr.mxu0 %v521_v15  ;;  %1847 = vmatprep.subr.mxu1 %v553_v16  ;;  %v563_v16 = vld [vmem:[#allocation2] sm:$0x1] }
  0xcc   : > { %1813 = vmatpush3.msra.mxu0 %v505_v17  ;;  %1848 = vmatpush3.msra.mxu1 %v537_v19  ;;  %v564_v17 = vld [vmem:[#allocation2 + $0x1] sm:$0x1] }
  0xcd   : > { %1814 = vmatprep.subr.mxu0 %v520_v21  ;;  %1849 = vmatprep.subr.mxu1 %v552_v22 }
  0xce   : > { %1815 = vmatpush3.msra.mxu0 %v504_v23  ;;  %1850 = vmatpush3.msra.mxu1 %v536_v24 }
  0xcf   : > { %1816 = vmatprep.subr.mxu0 %v519_v25  ;;  %1851 = vmatprep.subr.mxu1 %v551_v26  ;;  %v2593_v25 = vld [vmem:[#allocation9] sm:$0x1] }
  0xd0   : > { %1817 = vmatpush3.msra.mxu0 %v503_v27  ;;  %1852 = vmatpush3.msra.mxu1 %v535_v28 }
  0xd1   : > { %1818 = vmatprep.subr.mxu0 %v518_v29  ;;  %1853 = vmatprep.subr.mxu1 %v550_v30 }
  0xd2   : > { %1819 = vmatpush3.msra.mxu0 %v502_v31  ;;  %1854 = vmatpush3.msra.mxu1 %v534_v8 }
  0xd3   : > { %1820 = vmatprep.subr.mxu0 %v517_v32  ;;  %1855 = vmatprep.subr.mxu1 %v549_v33  ;;  %v565_v32 = vld [vmem:[#allocation2 + $0x2] sm:$0x1] }
  0xd4   : > { %1821 = vmatpush3.msra.mxu0 %v501_v18  ;;  %1856 = vmatpush3.msra.mxu1 %v533_v34  ;;  %v566_v34 = vld [vmem:[#allocation2 + $0x3] sm:$0x1] }
  0xd5   : > { %1822 = vmatprep.subr.mxu0 %v516_v35  ;;  %1857 = vmatprep.subr.mxu1 %v548_v36 }
  0xd6   : > { %1823 = vmatpush3.msra.mxu0 %v500_v37  ;;  %1858 = vmatpush3.msra.mxu1 %v532_v38 }
  0xd7   : > { %1824 = vmatprep.subr.mxu0 %v515_v39  ;;  %1859 = vmatprep.subr.mxu1 %v547_v40 }
  0xd8   : > { %1825 = vmatpush3.msra.mxu0 %v499_v41  ;;  %1860 = vmatpush3.msra.mxu1 %v531_v44 }
  0xd9   : > { %1826 = vmatprep.subr.mxu0 %v514_v45  ;;  %1861 = vmatprep.subr.mxu1 %v546_v47 }
  0xda   : > { %1827 = vmatpush3.msra.mxu0 %v498_v48  ;;  %1862 = vmatpush3.msra.mxu1 %v530_v49  ;;  %v567_v48 = vld [vmem:[#allocation2 + $0x4] sm:$0x1] }
  0xdb   : > { %1828 = vmatprep.subr.mxu0 %v513_v50  ;;  %1863 = vmatprep.subr.mxu1 %v545_v11  ;;  %v568_v11 = vld [vmem:[#allocation2 + $0x5] sm:$0x1] }
  0xdc   : > { %1829 = vmatpush3.msra.mxu0 %v497_v51  ;;  %1177 = vmatprep.mubr.f32.mxu0 %v1110_v52 }
  0xdd   : > { %1864 = vmatpush3.msra.mxu1 %v529_v53  ;;  %1257 = vmatprep.mubr.f32.mxu1 %v1190_v20 }
  0xde   : > { %1178 = vmatmul.mubr.f32.vlgmr.msra.gmra.mxu0 %v1106_v54  ;;  %1258 = vmatmul.mubr.f32.vlgmr.msra.gmra.mxu1 %v1186_v57 }
 0x10f   : > { %v1282_v59 = vpop.xlane.xlu0 %1281 }
 0x110   : > { %v1283_v60 = vadd.f32 %v1282_v59, %v1279_v58 }
 0x112   : > { %1285 = vst.msk [vmem:[#allocation3] sm:$0xff] %vm303_vm0, %v1283_v60 }
 0x119   : > { %v1289_v55 = vld [vmem:[#allocation3] sm:$0xff] }
 0x11a   : > { %v1290_v56 = vmax.f32 %v1289_v55, 1e-09 }
 0x11c   : > { %v1351_v63 = vrot.slane %v1290_v56, %v1350_v61  ;;  %v1344_v0 = vrot.slane %v1290_v56, %v2335_v2  ;;  %v1365_v1 = vrot.slane %v1290_v56, %v1364_v62  ;;  %v1337_v4 = vrot.slane %v1290_v56, %v2344_v10  ;;  %v569_v62 = vld [vmem:[#allocation2 + $0x6] sm:$0x1] }
 0x11d   : > { %v1379_v6 = vrot.slane %v1290_v56, %v1378_v3  ;;  %v1358_v7 = vrot.slane %v1290_v56, %v1357_v5  ;;  %v1372_v12 = vrot.slane %v1290_v56, %v1371_v9  ;;  %v1385_v2 = vsub.s32 7, %v2305_v43 }
 0x11e   : > { %1353 = vbcast.lane.b32.xlu1 %v1351_v63, 256  ;;  %1346 = vbcast.lane.b32.xlu0 %v1344_v0, 256 }
 0x11f   : > { %v1386_v13 = vrot.slane %v1290_v56, %v1385_v2 }
 0x122   : > { %1367 = vbcast.lane.b32.xlu1 %v1365_v1, 256  ;;  %1339 = vbcast.lane.b32.xlu0 %v1337_v4, 256  ;;  %v570_v1 = vld [vmem:[#allocation2 + $0x7] sm:$0x1] }
 0x126   : > { %1381 = vbcast.lane.b32.xlu1 %v1379_v6, 256  ;;  %1360 = vbcast.lane.b32.xlu0 %v1358_v7, 256 }
 0x12a   : > { %1374 = vbcast.lane.b32.xlu0 %v1372_v12, 256 }
 0x12e   : > { %1388 = vbcast.lane.b32.xlu0 %v1386_v13, 256 }
 0x137   : > { %v1620_v14 = vpop.f32.mrf.mxu0 }
 0x138   : > { %v1655_v15 = vpop.f32.mrf.mxu1 }
 0x139   : > { %v1621_v10 = vpop.f32.mrf.mxu0 }
 0x13a   : > { %v1656_v19 = vpop.f32.mrf.mxu1  ;;  %v1622_v21 = vadd.f32 %v1621_v10, %v1620_v14 }
 0x13b   : > { %v1657_v22 = vadd.f32 %v1656_v19, %v1655_v15 }
 0x13c   : > { %v1263_v23 = vadd.f32 %v1622_v21, %v563_v16 }
 0x13d   : > { %v1264_v24 = vadd.f32 %v1657_v22, %v564_v17 }
 0x13e   : > { %1271 = vst [vmem:[#allocation2] sm:$0x1] %v1263_v23 }
 0x13f   : > { %1272 = vst [vmem:[#allocation2 + $0x1] sm:$0x1] %v1264_v24 }
 0x145   : > { %v1291_v27 = vld [vmem:[#allocation2] sm:$0x1] }
 0x146   : > { %v1292_v26 = vld [vmem:[#allocation2 + $0x1] sm:$0x1]  ;;  %v1300_v29 = vmul.f32 %v2593_v25, %v1291_v27 }
 0x147   : > { %v1301_v43 = vmul.f32 %v2593_v25, %v1292_v26 }
 0x148   : > { %v1309_v30 = vsel %vm1308_vm1, %v1300_v29, 0.0 }
 0x149   : > { %v1312_v28 = vsel %vm1308_vm1, %v1301_v43, 0.0 }
 0x14a   : > { %1313 = vadd.xlane.f32.xlu1 %v1312_v28 }
 0x14e   : > { %1310 = vadd.xlane.f32.xlu1 %v1309_v30 }
 0x15a   : > { %v1690_v31 = vpop.f32.mrf.mxu0  ;;  %v1725_v8 = vpop.f32.mrf.mxu1 }
 0x15c   : > { %v1691_v33 = vpop.f32.mrf.mxu0  ;;  %v1726_v35 = vpop.f32.mrf.mxu1 }
 0x15d   : > { %v1692_v18 = vadd.f32 %v1691_v33, %v1690_v31  ;;  %v1727_v36 = vadd.f32 %v1726_v35, %v1725_v8 }
 0x15f   : > { %v1265_v37 = vadd.f32 %v1692_v18, %v565_v32  ;;  %v1266_v38 = vadd.f32 %v1727_v36, %v566_v34  ;;  %v1415_v34 = vstv %s1414_s24 }
 0x161   : > { %1273 = vst [vmem:[#allocation2 + $0x2] sm:$0x1] %v1265_v37  ;;  %1274 = vst [vmem:[#allocation2 + $0x3] sm:$0x1] %v1266_v38 }
 0x168   : > { %v1293_v39 = vld [vmem:[#allocation2 + $0x2] sm:$0x1]  ;;  %v1294_v41 = vld [vmem:[#allocation2 + $0x3] sm:$0x1] }
 0x169   : > { %v1302_v40 = vmul.f32 %v2593_v25, %v1293_v39  ;;  %v1303_v44 = vmul.f32 %v2593_v25, %v1294_v41 }
 0x16b   : > { %v1315_v42 = vsel %vm1308_vm1, %v1302_v40, 0.0  ;;  %v1318_v45 = vsel %vm1308_vm1, %v1303_v44, 0.0 }
 0x16c   : > { %1316 = vadd.xlane.f32.xlu0 %v1315_v42 }
 0x170   : > { %1319 = vadd.xlane.f32.xlu0 %v1318_v45 }
 0x17c   : > { %v1760_v46 = vpop.f32.mrf.mxu0  ;;  %v1795_v47 = vpop.f32.mrf.mxu1 }
 0x17e   : > { %v1761_v49 = vpop.f32.mrf.mxu0  ;;  %v1796_v51 = vpop.f32.mrf.mxu1 }
 0x17f   : > { %v1762_v50 = vadd.f32 %v1761_v49, %v1760_v46  ;;  %v1797_v52 = vadd.f32 %v1796_v51, %v1795_v47 }
 0x181   : > { %v1267_v53 = vadd.f32 %v1762_v50, %v567_v48  ;;  %v1268_v20 = vadd.f32 %v1797_v52, %v568_v11 }
 0x183   : > { %1275 = vst [vmem:[#allocation2 + $0x4] sm:$0x1] %v1267_v53  ;;  %1276 = vst [vmem:[#allocation2 + $0x5] sm:$0x1] %v1268_v20 }
 0x18a   : > { %v1295_v54 = vld [vmem:[#allocation2 + $0x4] sm:$0x1]  ;;  %v1296_v58 = vld [vmem:[#allocation2 + $0x5] sm:$0x1] }
 0x18b   : > { %v1304_v57 = vmul.f32 %v2593_v25, %v1295_v54  ;;  %v1305_v59 = vmul.f32 %v2593_v25, %v1296_v58 }
 0x18d   : > { %v1321_v60 = vsel %vm1308_vm1, %v1304_v57, 0.0  ;;  %v1324_v61 = vsel %vm1308_vm1, %v1305_v59, 0.0 }
 0x18e   : > { %1322 = vadd.xlane.f32.xlu0 %v1321_v60  ;;  %1325 = vadd.xlane.f32.xlu1 %v1324_v61 }
 0x190   : > { %v1347_v15 = vpop.permute.xlu0 %1346  ;;  %v1354_v17 = vpop.permute.xlu1 %1353 }
 0x191   : > { %1945 = vrcp.f32 %v1347_v15 }
 0x192   : > { %1947 = vrcp.f32 %v1354_v17 }
 0x194   : > { %v1340_v16 = vpop.permute.xlu0 %1339  ;;  %v1368_v21 = vpop.permute.xlu1 %1367 }
 0x195   : > { %1949 = vrcp.f32 %v1340_v16 }
 0x198   : > { %v1361_v10 = vpop.permute.xlu0 %1360  ;;  %v1382_v23 = vpop.permute.xlu1 %1381 }
 0x199   : > { %1951 = vrcp.f32 %v1361_v10 }
 0x19a   : > { %1953 = vrcp.f32 %v1368_v21 }
 0x19c   : > { %v1375_v19 = vpop.permute.xlu0 %1374 }
 0x19d   : > { %1955 = vrcp.f32 %v1375_v19 }
 0x19e   : > { %v1830_v55 = vpop.f32.mrf.mxu0  ;;  %v1865_v56 = vpop.f32.mrf.mxu1  ;;  %1957 = vrcp.f32 %v1382_v23 }
 0x19f   : > { %v1946_v43 = vpop.eup %1945 }
 0x1a0   : > { %v1831_v63 = vpop.f32.mrf.mxu0  ;;  %v1866_v3 = vpop.f32.mrf.mxu1 }
 0x1a1   : > { %v1832_v0 = vadd.f32 %v1831_v63, %v1830_v55  ;;  %v1867_v4 = vadd.f32 %v1866_v3, %v1865_v56  ;;  %v1389_v22 = vpop.permute.xlu0 %1388  ;;  %v1948_v27 = vpop.eup %1947 }
 0x1a2   : > { %v1950_v29 = vpop.eup %1949  ;;  %1959 = vrcp.f32 %v1389_v22 }
 0x1a3   : > { %v1269_v5 = vadd.f32 %v1832_v0, %v569_v62  ;;  %v1270_v6 = vadd.f32 %v1867_v4, %v570_v1 }
 0x1a5   : > { %1277 = vst [vmem:[#allocation2 + $0x6] sm:$0x1] %v1269_v5  ;;  %1278 = vst [vmem:[#allocation2 + $0x7] sm:$0x1] %v1270_v6 }
 0x1a6   : > { %v1952_v31 = vpop.eup %1951 }
 0x1a7   : > { %v1954_v32 = vpop.eup %1953 }
 0x1aa   : > { %v1956_v38 = vpop.eup %1955 }
 0x1ab   : > { %v1958_v11 = vpop.eup %1957 }
 0x1ac   : > { %v1297_v7 = vld [vmem:[#allocation2 + $0x6] sm:$0x1]  ;;  %v1298_v12 = vld [vmem:[#allocation2 + $0x7] sm:$0x1] }
 0x1ad   : > { %v1306_v9 = vmul.f32 %v2593_v25, %v1297_v7  ;;  %v1307_v2 = vmul.f32 %v2593_v25, %v1298_v12 }
 0x1af   : > { %v1327_v13 = vsel %vm1308_vm1, %v1306_v9, 0.0  ;;  %v1330_v14 = vsel %vm1308_vm1, %v1307_v2, 0.0  ;;  %v1960_v53 = vpop.eup %1959 }
 0x1b0   : > { %1328 = vadd.xlane.f32.xlu0 %v1327_v13  ;;  %1331 = vadd.xlane.f32.xlu1 %v1330_v14 }
 0x1d3   : > { %v1314_v25 = vpop.xlane.xlu1 %1313 }
 0x1d4   : > { %v1401_v33 = vmul.f32 %v1946_v43, %v1314_v25 }
 0x1d6   : > { %v1417_v40 = vadd.f32 %v1415_v34, %v1401_v33 }
 0x1d7   : > { %v1311_v28 = vpop.xlane.xlu1 %1310 }
 0x1d8   : > { %v1399_v37 = vmul.f32 %v1950_v29, %v1311_v28  ;;  %v1432_v47 = vrot.slane %v1417_v40, 7 }
 0x1da   : > { %v1416_v45 = vadd.f32 %v1415_v34, %v1399_v37 }
 0x1dc   : > { %v1434_v51 = vsel %vm1433_vm2, %v1432_v47, %v1416_v45 }
 0x1f5   : > { %v1317_v24 = vpop.xlane.xlu0 %1316 }
 0x1f6   : > { %v1403_v8 = vmul.f32 %v1948_v27, %v1317_v24 }
 0x1f8   : > { %v1418_v39 = vadd.f32 %v1415_v34, %v1403_v8 }
 0x1f9   : > { %v1320_v26 = vpop.xlane.xlu0 %1319 }
 0x1fa   : > { %v1405_v18 = vmul.f32 %v1952_v31, %v1320_v26  ;;  %v1435_v46 = vrot.slane %v1418_v39, 6 }
 0x1fc   : > { %v1419_v41 = vadd.f32 %v1415_v34, %v1405_v18  ;;  %v1437_v20 = vsel %vm1436_vm3, %v1435_v46, %v1434_v51 }
 0x1fe   : > { %v1438_v48 = vrot.slane %v1419_v41, 5 }
 0x200   : > { %v1440_v58 = vsel %vm1439_vm4, %v1438_v48, %v1437_v20 }
 0x217   : > { %v1323_v30 = vpop.xlane.xlu0 %1322  ;;  %v1326_v36 = vpop.xlane.xlu1 %1325 }
 0x218   : > { %v1407_v35 = vmul.f32 %v1954_v32, %v1323_v30  ;;  %v1409_v42 = vmul.f32 %v1956_v38, %v1326_v36 }
 0x21a   : > { %v1420_v44 = vadd.f32 %v1415_v34, %v1407_v35  ;;  %v1421_v49 = vadd.f32 %v1415_v34, %v1409_v42 }
 0x21c   : > { %v1441_v50 = vrot.slane %v1420_v44, 4  ;;  %v1444_v59 = vrot.slane %v1421_v49, 3 }
 0x21e   : > { %v1443_v61 = vsel %vm1442_vm5, %v1441_v50, %v1440_v58 }
 0x21f   : > { %v1446_v63 = vsel %vm1445_vm6, %v1444_v59, %v1443_v61 }
 0x239   : > { %v1329_v52 = vpop.xlane.xlu0 %1328  ;;  %v1332_v57 = vpop.xlane.xlu1 %1331 }
 0x23a   : > { %v1411_v54 = vmul.f32 %v1958_v11, %v1329_v52  ;;  %v1413_v60 = vmul.f32 %v1960_v53, %v1332_v57 }
 0x23c   : > { %v1422_v55 = vadd.f32 %v1415_v34, %v1411_v54  ;;  %v1423_v56 = vadd.f32 %v1415_v34, %v1413_v60 }
 0x23e   : > { %v1447_v62 = vrot.slane %v1422_v55, 2  ;;  %v1450_v0 = vrot.slane %v1423_v56, 1 }
 0x240   : > { %v1449_v1 = vsel %vm1448_vm7, %v1447_v62, %v1446_v63 }
 0x241   : > { %v1452_v3 = vsel %vm1451_vm8, %v1450_v0, %v1449_v1 }
 0x242   : > { %1454 = vst.msk [vmem:[%s290_s15] sm:$0xff] %vm303_vm0, %v1452_v3 }
 0x243 PF: > { %s21_s22 = sadd.s32 1, %s2101_s22   ;;  %s2655_s17 = smov %s2085_s18 }
 0x244   : > { %p18_p12 = scmp.ge.s32.totalorder %s21_s22, 4   ;;  %s2656_s18 = smov %s2089_s19 }
 0x245   : > { %s2657_s19 = smov %s2232_s12  ;;  %s2658_s20 = smov %s2097_s21 }
 0x246   : > { %s2659_s21 = smov %s2661_s9  ;;  %20 = sbr.rel (!%p18_p12) target bundleno = 10 (0xa), region = 101 }
 0x24b   :  { %1474 = vsyncpa [#allocation6], 1 }
 0x24c   :  { %1476 = vsyncpa [#allocation6 + $0x1], 1 }
 0x24d   :  { %1477 = vsyncpa [#allocation8], 1 }
 0x24e   :  { %1479 = vsyncpa [#allocation8 + $0x1], 1 }

</bundles_post_ra>
